<compile_context>
chip_gen: v6e
topology: v6e:2x2x1
jax: 0.10.0
libtpu: 0.0.40
codegen_flags: <defaults>
</compile_context>

<pallas_src>
import functools

import jax
import jax.numpy as jnp
from jax.experimental import pallas as pl
from jax.experimental.pallas import tpu as pltpu


def _round_up(x: int, m: int) -> int:
    return (x + m - 1) // m * m


# --------------------------------------------------------------------------- #
# Pass 1: per row tile, accumulate agg1 = A' @ x over column tiles, then
#         h = relu(relu(agg1 @ w1 + b1) @ w2 + b2)   and   v = h @ w3   (N, 1)
# --------------------------------------------------------------------------- #
def _gin1_kernel(a_ref, xc_ref, w1_ref, b1_ref, w2_ref, b2_ref, w3r_ref,
                 v_ref, acc_ref):
    k = pl.program_id(1)

    @pl.when(k == 0)
    def _():
        acc_ref[...] = jnp.zeros_like(acc_ref)

    # A' streamed from HBM as bf16 (exact small-integer multiplicities), upcast
    # in-register; f32 accumulation.  (HBM-bound on A', so f32 MXU rate is not the
    # binding resource; cast xc_ref[...] to bf16 here for a full-bf16 MXU path.)
    a = a_ref[...].astype(jnp.float32)
    acc_ref[...] += jnp.dot(a, xc_ref[...], preferred_element_type=jnp.float32)

    @pl.when(k == pl.num_programs(1) - 1)
    def _():
        agg = acc_ref[...]                                            # (tm, F)
        h = jnp.dot(agg, w1_ref[...], preferred_element_type=jnp.float32) + b1_ref[...]
        h = jnp.maximum(h, 0.0)                                       # ReLU inside mlp1
        h = jnp.dot(h, w2_ref[...], preferred_element_type=jnp.float32) + b2_ref[...]
        h = jnp.maximum(h, 0.0)                                       # F.relu(gin1(x))
        # 1-wide projection h @ w3: VPU multiply + XLU lane reduction (off the MXU).
        v_ref[...] = jnp.sum(h * w3r_ref[...], axis=-1, keepdims=True)


# --------------------------------------------------------------------------- #
# Pass 2: per row tile, accumulate u = A' @ v over column tiles, then
#         s  = sigmoid(relu(u + b3) * w4 + b4)
#         (associativity: agg2 @ w3 + b3 == A' @ (h @ w3) + b3 == A' @ v + b3)
#         x2 = s * x      and     m2_partial = P_cols @ x2
# --------------------------------------------------------------------------- #
def _gin2_kernel(scal_ref, a_ref, vc_ref, xr_ref, p_ref,
                 x2_ref, m2p_ref, acc_ref):
    k = pl.program_id(1)

    @pl.when(k == 0)
    def _():
        acc_ref[...] = jnp.zeros_like(acc_ref)

    a = a_ref[...].astype(jnp.float32)
    acc_ref[...] += jnp.dot(a, vc_ref[...], preferred_element_type=jnp.float32)

    @pl.when(k == pl.num_programs(1) - 1)
    def _():
        b3 = scal_ref[0]
        w4 = scal_ref[1]
        b4 = scal_ref[2]
        g = jnp.maximum(acc_ref[...] + b3, 0.0) * w4 + b4             # mlp2 tail
        s = jax.nn.sigmoid(g)                                         # (tm, 1)
        x2 = s * xr_ref[...]                                          # gate features
        x2_ref[...] = x2
        m2p_ref[0] = jnp.dot(p_ref[...], x2, preferred_element_type=jnp.float32)


@functools.partial(jax.jit, static_argnames=("num_graphs",))
def node_drop_forward(x, edge_index, batch, params, num_graphs):
    """x: (N, F) f32, edge_index: (2, E) i32, batch: (N,) i32."""
    n, f = x.shape
    hidden = params["w1"].shape[1]

    # ---- tiling: largest square A' tile up to 512; N padded to a tile multiple ----
    tile = min(512, _round_up(n, 128))
    n_pad = _round_up(n, tile)
    n_i = n_pad // tile      # row tiles          -> "parallel" (v7x megacore)
    n_k = n_pad // tile      # contraction tiles  -> "arbitrary" (innermost)

    # ---- dense padded operands (plain-JAX glue) ----
    # TODO(synk): for large sparse graphs, replace the dense N x N adjacency with a
    # CSR (offsets/indices) scalar-prefetch path + manual make_async_copy gathers
    # (O(E*F) instead of O(N^2*F)); the dense path is kept for small/moderate N.
    src, dst = edge_index[0], edge_index[1]
    adj = jnp.zeros((n_pad, n_pad), jnp.float32).at[dst, src].add(1.0)
    adj = adj + jnp.eye(n_pad, dtype=jnp.float32)       # GIN self term, eps = 0
    adj = adj.astype(jnp.bfloat16)                      # exact (small integers)

    x_p = jnp.zeros((n_pad, f), jnp.float32).at[:n].set(x)

    batch_p = jnp.full((n_pad,), -1, jnp.int32).at[:n].set(batch)
    pool = (batch_p[None, :] == jnp.arange(num_graphs)[:, None]).astype(jnp.float32)

    # gin2 tail scalars live in SMEM: [b3, w4, b4]
    scal = jnp.stack([params["b3"][0, 0], params["w4"][0, 0], params["b4"][0, 0]])
    w3_row = jnp.transpose(params["w3"])                # (1, H)

    # explicit VMEM budget: double-buffered A'/x tiles + f32 upcast temp + scratch
    vmem_limit = int(min(
        48 * 1024 * 1024,
        2 * tile * tile * 2          # A' tile, bf16, double-buffered
        + tile * tile * 4            # in-register f32 upcast of A'
        + 4 * tile * f * 4           # x / x2 tiles, double-buffered
        + tile * max(f, hidden) * 4  # accumulator scratch
        + 16 * 1024 * 1024))         # weights / outputs / compiler headroom
    cparams = pltpu.CompilerParams(
        dimension_semantics=("parallel", "arbitrary"),
        vmem_limit_bytes=vmem_limit,
    )

    # ---- pass 1: v = h @ w3,   h = relu(mlp1(A' @ x)) ----
    v = pl.pallas_call(
        _gin1_kernel,
        out_shape=jax.ShapeDtypeStruct((n_pad, 1), jnp.float32),
        grid_spec=pltpu.PrefetchScalarGridSpec(
            num_scalar_prefetch=0,
            grid=(n_i, n_k),
            in_specs=[
                pl.BlockSpec((tile, tile), lambda i, k: (i, k)),       # A'
                pl.BlockSpec((tile, f), lambda i, k: (k, 0)),          # x (contraction cols)
                pl.BlockSpec((f, hidden), lambda i, k: (0, 0)),        # w1 (resident)
                pl.BlockSpec((1, hidden), lambda i, k: (0, 0)),        # b1
                pl.BlockSpec((hidden, hidden), lambda i, k: (0, 0)),   # w2
                pl.BlockSpec((1, hidden), lambda i, k: (0, 0)),        # b2
                pl.BlockSpec((1, hidden), lambda i, k: (0, 0)),        # w3^T
            ],
            out_specs=pl.BlockSpec((tile, 1), lambda i, k: (i, 0)),
            scratch_shapes=[pltpu.VMEM((tile, f), jnp.float32)],
        ),
        compiler_params=cparams,
    )(adj, x_p, params["w1"], params["b1"], params["w2"], params["b2"], w3_row)

    # ---- pass 2: gate + pool ----
    x2_p, m2_part = pl.pallas_call(
        _gin2_kernel,
        out_shape=(
            jax.ShapeDtypeStruct((n_pad, f), jnp.float32),             # x2 (padded)
            jax.ShapeDtypeStruct((n_i, num_graphs, f), jnp.float32),   # per-row-tile pools
        ),
        grid_spec=pltpu.PrefetchScalarGridSpec(
            num_scalar_prefetch=0,
            grid=(n_i, n_k),
            in_specs=[
                pl.BlockSpec(memory_space=pltpu.MemorySpace.SMEM),     # [b3, w4, b4]
                pl.BlockSpec((tile, tile), lambda i, k: (i, k)),       # A'
                pl.BlockSpec((tile, 1), lambda i, k: (k, 0)),          # v (contraction cols)
                pl.BlockSpec((tile, f), lambda i, k: (i, 0)),          # x (rows, gating)
                pl.BlockSpec((num_graphs, tile), lambda i, k: (0, i)), # pool columns
            ],
            out_specs=(
                pl.BlockSpec((tile, f), lambda i, k: (i, 0)),
                pl.BlockSpec((1, num_graphs, f), lambda i, k: (i, 0, 0)),
            ),
            scratch_shapes=[pltpu.VMEM((tile, 1), jnp.float32)],
        ),
        compiler_params=cparams,
    )(scal, adj, v, x_p, pool)

    m2 = jnp.sum(m2_part, axis=0)      # tiny (n_i, G, F) reduction of partial pools
    return m2, x2_p[:n]


def node_drop_reference(x, edge_index, batch, params, num_graphs):
    """Pure-JAX f32 reference of the PyTorch forward."""
    n, _ = x.shape
    src, dst = edge_index[0], edge_index[1]
    adj = jnp.zeros((n, n), jnp.float32).at[dst, src].add(1.0)

    def gin(h, w_a, b_a, w_b, b_b):
        agg = adj @ h + h                 # eps = 0
        z = jnp.maximum(agg @ w_a + b_a, 0.0)
        return z @ w_b + b_b

    h = jnp.maximum(gin(x, params["w1"], params["b1"], params["w2"], params["b2"]), 0.0)
    g = gin(h, params["w3"], params["b3"], params["w4"], params["b4"])
    s = jax.nn.sigmoid(g)
    x2 = s * x
    pool = (batch[None, :] == jnp.arange(num_graphs)[:, None]).astype(jnp.float32)
    m2 = pool @ x2
    return m2, x2


def init_params(key, input_dim, hidden_dim):
    ks = jax.random.split(key, 8)

    def lin(kw, kb, fan_in, fan_out):
        bound = 1.0 / jnp.sqrt(fan_in)
        w = jax.random.uniform(kw, (fan_in, fan_out), jnp.float32, -bound, bound)
        b = jax.random.uniform(kb, (1, fan_out), jnp.float32, -bound, bound)
        return w, b

    w1, b1 = lin(ks[0], ks[1], input_dim, hidden_dim)   # gin1: Linear(F, H)
    w2, b2 = lin(ks[2], ks[3], hidden_dim, hidden_dim)  # gin1: Linear(H, H)
    w3, b3 = lin(ks[4], ks[5], hidden_dim, 1)           # gin2: Linear(H, 1)
    w4, b4 = lin(ks[6], ks[7], 1, 1)                    # gin2: Linear(1, 1)
    return dict(w1=w1, b1=b1, w2=w2, b2=b2, w3=w3, b3=b3, w4=w4, b4=b4)


if __name__ == "__main__":
    key = jax.random.PRNGKey(0)
    k_x, k_p = jax.random.split(key)

    num_nodes = 8
    input_dim = 32
    hidden_dim = 32
    num_graphs = 2

    x = jax.random.normal(k_x, (num_nodes, input_dim), jnp.float32)

    # Two small graphs of 4 nodes each: chain edges in both directions.
    src = jnp.array([0, 1, 1, 2, 2, 3, 4, 5, 5, 6, 6, 7], jnp.int32)
    dst = jnp.array([1, 0, 2, 1, 3, 2, 5, 4, 6, 5, 7, 6], jnp.int32)
    edge_index = jnp.stack([src, dst])
    batch = jnp.array([0, 0, 0, 0, 1, 1, 1, 1], jnp.int32)

    params = init_params(k_p, input_dim, hidden_dim)

    m2, x2 = node_drop_forward(x, edge_index, batch, params, num_graphs)
    jax.block_until_ready((m2, x2))

    m2_ref, x2_ref = node_drop_reference(x, edge_index, batch, params, num_graphs)
    assert m2.shape == (num_graphs, input_dim) and x2.shape == (num_nodes, input_dim)
    # A' is exact in bf16 and all matmul operands stay f32 in-register, so the only
    # deviation from the f32 reference is summation-order rounding (~1e-6 relative).
    assert jnp.allclose(m2, m2_ref, atol=1e-4, rtol=1e-4)
    assert jnp.allclose(x2, x2_ref, atol=1e-4, rtol=1e-4)

    print("KERNEL_OK")
</pallas_src>

<mosaic_0001>
module attributes {stable_mosaic.version = 11 : i64} {
  func.func @_gin1_kernel(%arg0: i32, %arg1: i32, %arg2: memref<128x128xbf16, #tpu.memory_space<vmem>>, %arg3: memref<128x32xf32, #tpu.memory_space<vmem>>, %arg4: memref<32x32xf32, #tpu.memory_space<vmem>>, %arg5: memref<1x32xf32, #tpu.memory_space<vmem>>, %arg6: memref<32x32xf32, #tpu.memory_space<vmem>>, %arg7: memref<1x32xf32, #tpu.memory_space<vmem>>, %arg8: memref<1x32xf32, #tpu.memory_space<vmem>>, %arg9: memref<128x1xf32, #tpu.memory_space<vmem>>, %arg10: memref<128x32xf32, #tpu.memory_space<vmem>>) attributes {dimension_semantics = [#tpu.dimension_semantics<parallel>, #tpu.dimension_semantics<arbitrary>], iteration_bounds = array<i64: 1, 1>, scalar_prefetch = 0 : i64, scratch_operands = 1 : i64, tpu.core_type = #tpu.core_type<tc>, window_params = [{transform_indices = @transform_0, window_bounds = array<i64: 128, 128>}, {transform_indices = @transform_1, window_bounds = array<i64: 128, 32>}, {pipeline_mode = #tpu.pipeline_mode<synchronous>, transform_indices = @transform_2, window_bounds = array<i64: 32, 32>}, {pipeline_mode = #tpu.pipeline_mode<synchronous>, transform_indices = @transform_3, window_bounds = array<i64: 1, 32>}, {pipeline_mode = #tpu.pipeline_mode<synchronous>, transform_indices = @transform_4, window_bounds = array<i64: 32, 32>}, {pipeline_mode = #tpu.pipeline_mode<synchronous>, transform_indices = @transform_5, window_bounds = array<i64: 1, 32>}, {pipeline_mode = #tpu.pipeline_mode<synchronous>, transform_indices = @transform_6, window_bounds = array<i64: 1, 32>}, {transform_indices = @transform_7, window_bounds = array<i64: 128, 1>}]} {
    %c0_i32 = arith.constant 0 : i32
    %0 = arith.cmpi eq, %arg1, %c0_i32 : i32
    %1 = arith.extui %0 : i1 to i32
    %c0_i32_0 = arith.constant 0 : i32
    %2 = arith.cmpi ne, %1, %c0_i32_0 : i32
    scf.if %2 {
      %cst_10 = arith.constant 0.000000e+00 : f32
      %13 = vector.broadcast %cst_10 : f32 to vector<128x32xf32>
      %c0_11 = arith.constant 0 : index
      %c0_12 = arith.constant 0 : index
      %14 = vector.load %arg10[%c0_11, %c0_12] : memref<128x32xf32, #tpu.memory_space<vmem>>, vector<128x32xf32>
      tpu.vector_store %arg10[%c0_11, %c0_12], %13 {strides = array<i32>} : memref<128x32xf32, #tpu.memory_space<vmem>>, vector<128x32xf32>,
    } else {
    }
    %c0 = arith.constant 0 : index
    %c0_1 = arith.constant 0 : index
    %3 = vector.load %arg2[%c0, %c0_1] : memref<128x128xbf16, #tpu.memory_space<vmem>>, vector<128x128xbf16>
    %4 = arith.extf %3 : vector<128x128xbf16> to vector<128x128xf32>
    %c0_2 = arith.constant 0 : index
    %c0_3 = arith.constant 0 : index
    %5 = vector.load %arg10[%c0_2, %c0_3] : memref<128x32xf32, #tpu.memory_space<vmem>>, vector<128x32xf32>
    %c0_4 = arith.constant 0 : index
    %c0_5 = arith.constant 0 : index
    %6 = vector.load %arg3[%c0_4, %c0_5] : memref<128x32xf32, #tpu.memory_space<vmem>>, vector<128x32xf32>
    %cst = arith.constant dense<0.000000e+00> : vector<128x32xf32>
    %7 = tpu.matmul %4, %6, %cst {dimension_numbers = #tpu.dot_dimension_numbers<[1], [0], [0], [1], [0, 0, 1, 1], [], []>} : vector<128x128xf32>, vector<128x32xf32>, vector<128x32xf32> -> vector<128x32xf32>
    %8 = arith.addf %5, %7 : vector<128x32xf32>
    %c0_6 = arith.constant 0 : index
    %c0_7 = arith.constant 0 : index
    %9 = vector.load %arg10[%c0_6, %c0_7] : memref<128x32xf32, #tpu.memory_space<vmem>>, vector<128x32xf32>
    tpu.vector_store %arg10[%c0_6, %c0_7], %8 {strides = array<i32>} : memref<128x32xf32, #tpu.memory_space<vmem>>, vector<128x32xf32>,
    %c0_i32_8 = arith.constant 0 : i32
    %10 = arith.cmpi eq, %arg1, %c0_i32_8 : i32
    %11 = arith.extui %10 : i1 to i32
    %c0_i32_9 = arith.constant 0 : i32
    %12 = arith.cmpi ne, %11, %c0_i32_9 : i32
    scf.if %12 {
      %c0_10 = arith.constant 0 : index
      %c0_11 = arith.constant 0 : index
      %13 = vector.load %arg10[%c0_10, %c0_11] : memref<128x32xf32, #tpu.memory_space<vmem>>, vector<128x32xf32>
      %c0_12 = arith.constant 0 : index
      %c0_13 = arith.constant 0 : index
      %14 = vector.load %arg4[%c0_12, %c0_13] : memref<32x32xf32, #tpu.memory_space<vmem>>, vector<32x32xf32>
      %cst_14 = arith.constant dense<0.000000e+00> : vector<128x32xf32>
      %15 = tpu.matmul %13, %14, %cst_14 {dimension_numbers = #tpu.dot_dimension_numbers<[1], [0], [0], [1], [0, 0, 1, 1], [], []>} : vector<128x32xf32>, vector<32x32xf32>, vector<128x32xf32> -> vector<128x32xf32>
      %c0_15 = arith.constant 0 : index
      %c0_16 = arith.constant 0 : index
      %16 = vector.load %arg5[%c0_15, %c0_16] : memref<1x32xf32, #tpu.memory_space<vmem>>, vector<1x32xf32>
      %17 = vector.broadcast %16 : vector<1x32xf32> to vector<128x32xf32>
      %18 = arith.addf %15, %17 : vector<128x32xf32>
      %cst_17 = arith.constant 0.000000e+00 : f32
      %19 = vector.broadcast %cst_17 : f32 to vector<128x32xf32>
      %20 = arith.maximumf %18, %19 : vector<128x32xf32>
      %c0_18 = arith.constant 0 : index
      %c0_19 = arith.constant 0 : index
      %21 = vector.load %arg6[%c0_18, %c0_19] : memref<32x32xf32, #tpu.memory_space<vmem>>, vector<32x32xf32>
      %cst_20 = arith.constant dense<0.000000e+00> : vector<128x32xf32>
      %22 = tpu.matmul %20, %21, %cst_20 {dimension_numbers = #tpu.dot_dimension_numbers<[1], [0], [0], [1], [0, 0, 1, 1], [], []>} : vector<128x32xf32>, vector<32x32xf32>, vector<128x32xf32> -> vector<128x32xf32>
      %c0_21 = arith.constant 0 : index
      %c0_22 = arith.constant 0 : index
      %23 = vector.load %arg7[%c0_21, %c0_22] : memref<1x32xf32, #tpu.memory_space<vmem>>, vector<1x32xf32>
      %24 = vector.broadcast %23 : vector<1x32xf32> to vector<128x32xf32>
      %25 = arith.addf %22, %24 : vector<128x32xf32>
      %cst_23 = arith.constant 0.000000e+00 : f32
      %26 = vector.broadcast %cst_23 : f32 to vector<128x32xf32>
      %27 = arith.maximumf %25, %26 : vector<128x32xf32>
      %c0_24 = arith.constant 0 : index
      %c0_25 = arith.constant 0 : index
      %28 = vector.load %arg8[%c0_24, %c0_25] : memref<1x32xf32, #tpu.memory_space<vmem>>, vector<1x32xf32>
      %29 = vector.broadcast %28 : vector<1x32xf32> to vector<128x32xf32>
      %30 = arith.mulf %27, %29 : vector<128x32xf32>
      %cst_26 = arith.constant dense<0.000000e+00> : vector<128xf32>
      %31 = vector.multi_reduction <add>, %30, %cst_26 [1] : vector<128x32xf32> to vector<128xf32>
      %32 = vector.shape_cast %31 : vector<128xf32> to vector<128x1xf32>
      %c0_27 = arith.constant 0 : index
      %c0_28 = arith.constant 0 : index
      %33 = vector.load %arg9[%c0_27, %c0_28] : memref<128x1xf32, #tpu.memory_space<vmem>>, vector<128x1xf32>
      tpu.vector_store %arg9[%c0_27, %c0_28], %32 {strides = array<i32>} : memref<128x1xf32, #tpu.memory_space<vmem>>, vector<128x1xf32>,
    } else {
    }
    return
  }
  func.func @transform_0(%arg0: i32, %arg1: i32) -> (i32, i32) {
    %c0_i32 = arith.constant 0 : i32
    return %arg0, %arg1 : i32, i32
  }
  func.func @transform_1(%arg0: i32, %arg1: i32) -> (i32, i32) {
    %c0_i32 = arith.constant 0 : i32
    %c0_i32_0 = arith.constant 0 : i32
    return %arg1, %c0_i32 : i32, i32
  }
  func.func @transform_2(%arg0: i32, %arg1: i32) -> (i32, i32) {
    %c0_i32 = arith.constant 0 : i32
    %c0_i32_0 = arith.constant 0 : i32
    %c0_i32_1 = arith.constant 0 : i32
    return %c0_i32, %c0_i32_0 : i32, i32
  }
  func.func @transform_3(%arg0: i32, %arg1: i32) -> (i32, i32) {
    %c0_i32 = arith.constant 0 : i32
    %c0_i32_0 = arith.constant 0 : i32
    %c0_i32_1 = arith.constant 0 : i32
    return %c0_i32, %c0_i32_0 : i32, i32
  }
  func.func @transform_4(%arg0: i32, %arg1: i32) -> (i32, i32) {
    %c0_i32 = arith.constant 0 : i32
    %c0_i32_0 = arith.constant 0 : i32
    %c0_i32_1 = arith.constant 0 : i32
    return %c0_i32, %c0_i32_0 : i32, i32
  }
  func.func @transform_5(%arg0: i32, %arg1: i32) -> (i32, i32) {
    %c0_i32 = arith.constant 0 : i32
    %c0_i32_0 = arith.constant 0 : i32
    %c0_i32_1 = arith.constant 0 : i32
    return %c0_i32, %c0_i32_0 : i32, i32
  }
  func.func @transform_6(%arg0: i32, %arg1: i32) -> (i32, i32) {
    %c0_i32 = arith.constant 0 : i32
    %c0_i32_0 = arith.constant 0 : i32
    %c0_i32_1 = arith.constant 0 : i32
    return %c0_i32, %c0_i32_0 : i32, i32
  }
  func.func @transform_7(%arg0: i32, %arg1: i32) -> (i32, i32) {
    %c0_i32 = arith.constant 0 : i32
    %c0_i32_0 = arith.constant 0 : i32
    return %arg0, %c0_i32 : i32, i32
  }
}

module attributes {stable_mosaic.version = 11 : i64} {
  func.func @_gin2_kernel(%arg0: i32, %arg1: i32, %arg2: memref<3xf32, #tpu.memory_space<smem>>, %arg3: memref<128x128xbf16, #tpu.memory_space<vmem>>, %arg4: memref<128x1xf32, #tpu.memory_space<vmem>>, %arg5: memref<128x32xf32, #tpu.memory_space<vmem>>, %arg6: memref<2x128xf32, #tpu.memory_space<vmem>>, %arg7: memref<128x32xf32, #tpu.memory_space<vmem>>, %arg8: memref<1x2x32xf32, #tpu.memory_space<vmem>>, %arg9: memref<128x1xf32, #tpu.memory_space<vmem>>) attributes {dimension_semantics = [#tpu.dimension_semantics<parallel>, #tpu.dimension_semantics<arbitrary>], iteration_bounds = array<i64: 1, 1>, scalar_prefetch = 0 : i64, scratch_operands = 1 : i64, tpu.core_type = #tpu.core_type<tc>, window_params = [{transform_indices = @transform_0, window_bounds = array<i64: 3>}, {transform_indices = @transform_1, window_bounds = array<i64: 128, 128>}, {transform_indices = @transform_2, window_bounds = array<i64: 128, 1>}, {transform_indices = @transform_3, window_bounds = array<i64: 128, 32>}, {transform_indices = @transform_4, window_bounds = array<i64: 2, 128>}, {transform_indices = @transform_5, window_bounds = array<i64: 128, 32>}, {transform_indices = @transform_6, window_bounds = array<i64: 1, 2, 32>}]} {
    %c0_i32 = arith.constant 0 : i32
    %0 = arith.cmpi eq, %arg1, %c0_i32 : i32
    %1 = arith.extui %0 : i1 to i32
    %c0_i32_0 = arith.constant 0 : i32
    %2 = arith.cmpi ne, %1, %c0_i32_0 : i32
    scf.if %2 {
      %cst_10 = arith.constant 0.000000e+00 : f32
      %13 = vector.broadcast %cst_10 : f32 to vector<128x1xf32>
      %c0_11 = arith.constant 0 : index
      %c0_12 = arith.constant 0 : index
      %14 = vector.load %arg9[%c0_11, %c0_12] : memref<128x1xf32, #tpu.memory_space<vmem>>, vector<128x1xf32>
      tpu.vector_store %arg9[%c0_11, %c0_12], %13 {strides = array<i32>} : memref<128x1xf32, #tpu.memory_space<vmem>>, vector<128x1xf32>,
    } else {
    }
    %c0 = arith.constant 0 : index
    %c0_1 = arith.constant 0 : index
    %3 = vector.load %arg3[%c0, %c0_1] : memref<128x128xbf16, #tpu.memory_space<vmem>>, vector<128x128xbf16>
    %4 = arith.extf %3 : vector<128x128xbf16> to vector<128x128xf32>
    %c0_2 = arith.constant 0 : index
    %c0_3 = arith.constant 0 : index
    %5 = vector.load %arg9[%c0_2, %c0_3] : memref<128x1xf32, #tpu.memory_space<vmem>>, vector<128x1xf32>
    %c0_4 = arith.constant 0 : index
    %c0_5 = arith.constant 0 : index
    %6 = vector.load %arg4[%c0_4, %c0_5] : memref<128x1xf32, #tpu.memory_space<vmem>>, vector<128x1xf32>
    %cst = arith.constant dense<0.000000e+00> : vector<128x1xf32>
    %7 = tpu.matmul %4, %6, %cst {dimension_numbers = #tpu.dot_dimension_numbers<[1], [0], [0], [1], [0, 0, 1, 1], [], []>} : vector<128x128xf32>, vector<128x1xf32>, vector<128x1xf32> -> vector<128x1xf32>
    %8 = arith.addf %5, %7 : vector<128x1xf32>
    %c0_6 = arith.constant 0 : index
    %c0_7 = arith.constant 0 : index
    %9 = vector.load %arg9[%c0_6, %c0_7] : memref<128x1xf32, #tpu.memory_space<vmem>>, vector<128x1xf32>
    tpu.vector_store %arg9[%c0_6, %c0_7], %8 {strides = array<i32>} : memref<128x1xf32, #tpu.memory_space<vmem>>, vector<128x1xf32>,
    %c0_i32_8 = arith.constant 0 : i32
    %10 = arith.cmpi eq, %arg1, %c0_i32_8 : i32
    %11 = arith.extui %10 : i1 to i32
    %c0_i32_9 = arith.constant 0 : i32
    %12 = arith.cmpi ne, %11, %c0_i32_9 : i32
    scf.if %12 {
      %c0_10 = arith.constant 0 : index
      %13 = memref.load %arg2[%c0_10] : memref<3xf32, #tpu.memory_space<smem>>
      %c1 = arith.constant 1 : index
      %14 = memref.load %arg2[%c1] : memref<3xf32, #tpu.memory_space<smem>>
      %c2 = arith.constant 2 : index
      %15 = memref.load %arg2[%c2] : memref<3xf32, #tpu.memory_space<smem>>
      %c0_11 = arith.constant 0 : index
      %c0_12 = arith.constant 0 : index
      %16 = vector.load %arg9[%c0_11, %c0_12] : memref<128x1xf32, #tpu.memory_space<vmem>>, vector<128x1xf32>
      %17 = vector.broadcast %13 : f32 to vector<128x1xf32>
      %18 = arith.addf %16, %17 : vector<128x1xf32>
      %cst_13 = arith.constant 0.000000e+00 : f32
      %19 = vector.broadcast %cst_13 : f32 to vector<128x1xf32>
      %20 = arith.maximumf %18, %19 : vector<128x1xf32>
      %21 = vector.broadcast %14 : f32 to vector<128x1xf32>
      %22 = arith.mulf %20, %21 : vector<128x1xf32>
      %23 = vector.broadcast %15 : f32 to vector<128x1xf32>
      %24 = arith.addf %22, %23 : vector<128x1xf32>
      %25 = arith.negf %24 : vector<128x1xf32>
      %26 = math.exp %25 : vector<128x1xf32>
      %cst_14 = arith.constant 1.000000e+00 : f32
      %27 = vector.broadcast %cst_14 : f32 to vector<128x1xf32>
      %28 = arith.addf %27, %26 : vector<128x1xf32>
      %29 = arith.divf %27, %28 : vector<128x1xf32>
      %c0_15 = arith.constant 0 : index
      %c0_16 = arith.constant 0 : index
      %30 = vector.load %arg5[%c0_15, %c0_16] : memref<128x32xf32, #tpu.memory_space<vmem>>, vector<128x32xf32>
      %31 = vector.broadcast %29 : vector<128x1xf32> to vector<128x32xf32>
      %32 = arith.mulf %31, %30 : vector<128x32xf32>
      %c0_17 = arith.constant 0 : index
      %c0_18 = arith.constant 0 : index
      %33 = vector.load %arg7[%c0_17, %c0_18] : memref<128x32xf32, #tpu.memory_space<vmem>>, vector<128x32xf32>
      tpu.vector_store %arg7[%c0_17, %c0_18], %32 {strides = array<i32>} : memref<128x32xf32, #tpu.memory_space<vmem>>, vector<128x32xf32>,
      %c0_19 = arith.constant 0 : index
      %c0_20 = arith.constant 0 : index
      %34 = vector.load %arg6[%c0_19, %c0_20] : memref<2x128xf32, #tpu.memory_space<vmem>>, vector<2x128xf32>
      %cst_21 = arith.constant dense<0.000000e+00> : vector<2x32xf32>
      %35 = tpu.matmul %34, %32, %cst_21 {dimension_numbers = #tpu.dot_dimension_numbers<[1], [0], [0], [1], [0, 0, 1, 1], [], []>} : vector<2x128xf32>, vector<128x32xf32>, vector<2x32xf32> -> vector<2x32xf32>
      %c0_22 = arith.constant 0 : index
      %c0_23 = arith.constant 0 : index
      %c0_24 = arith.constant 0 : index
      %36 = vector.load %arg8[%c0_22, %c0_23, %c0_24] : memref<1x2x32xf32, #tpu.memory_space<vmem>>, vector<1x2x32xf32>
      %37 = vector.shape_cast %36 : vector<1x2x32xf32> to vector<2x32xf32>
      %38 = vector.shape_cast %35 : vector<2x32xf32> to vector<1x2x32xf32>
      tpu.vector_store %arg8[%c0_22, %c0_23, %c0_24], %38 {strides = array<i32>} : memref<1x2x32xf32, #tpu.memory_space<vmem>>, vector<1x2x32xf32>,
    } else {
    }
    return
  }
  func.func @transform_0(%arg0: i32, %arg1: i32) -> i32 {
    %c0_i32 = arith.constant 0 : i32
    %c0_i32_0 = arith.constant 0 : i32
    return %c0_i32 : i32
  }
  func.func @transform_1(%arg0: i32, %arg1: i32) -> (i32, i32) {
    %c0_i32 = arith.constant 0 : i32
    return %arg0, %arg1 : i32, i32
  }
  func.func @transform_2(%arg0: i32, %arg1: i32) -> (i32, i32) {
    %c0_i32 = arith.constant 0 : i32
    %c0_i32_0 = arith.constant 0 : i32
    return %arg1, %c0_i32 : i32, i32
  }
  func.func @transform_3(%arg0: i32, %arg1: i32) -> (i32, i32) {
    %c0_i32 = arith.constant 0 : i32
    %c0_i32_0 = arith.constant 0 : i32
    return %arg0, %c0_i32 : i32, i32
  }
  func.func @transform_4(%arg0: i32, %arg1: i32) -> (i32, i32) {
    %c0_i32 = arith.constant 0 : i32
    %c0_i32_0 = arith.constant 0 : i32
    return %c0_i32, %arg0 : i32, i32
  }
  func.func @transform_5(%arg0: i32, %arg1: i32) -> (i32, i32) {
    %c0_i32 = arith.constant 0 : i32
    %c0_i32_0 = arith.constant 0 : i32
    return %arg0, %c0_i32 : i32, i32
  }
  func.func @transform_6(%arg0: i32, %arg1: i32) -> (i32, i32, i32) {
    %c0_i32 = arith.constant 0 : i32
    %c0_i32_0 = arith.constant 0 : i32
    %c0_i32_1 = arith.constant 0 : i32
    return %arg0, %c0_i32, %c0_i32_0 : i32, i32, i32
  }
}

</mosaic_0001>

<bundles_post_ra>
// kernel: node_drop_forward.2
= control target key start
LH: loop header
LB: loop body
LE: loop exit
PB: predicated region body
PF: predicated region fallthrough
CT: control target
= control target key end

     0   :  { %vm30_vm0 = vcmask 261120   ;;  %v1115_v2 = vmov 0.0   ;;  %vm819_vm1 = vcmask 7168   ;;  %s1441_s1 = inlined_call_operand.vmem [shape: f32[128,32], index: 1, kind: input, shape index: {}]   ;;  %s1442_s0 = inlined_call_operand.vmem [shape: bf16[128,128], index: 0, kind: input, shape index: {}]   ;;  %s1443_s2 = inlined_call_operand.vmem [shape: f32[32,32], index: 2, kind: input, shape index: {}]   ;;  %s1444_s4 = inlined_call_operand.vmem [shape: f32[32,32], index: 4, kind: input, shape index: {}]   ;;  %s1445_s3 = inlined_call_operand.vmem [shape: f32[1,32], index: 3, kind: input, shape index: {}]   ;;  %s1446_s5 = inlined_call_operand.vmem [shape: f32[1,32], index: 5, kind: input, shape index: {}]   ;;  %s1447_s6 = inlined_call_operand.vmem [shape: f32[1,32], index: 6, kind: input, shape index: {}]   ;;  %s1448_s7 = inlined_call_operand.vmem [shape: f32[128,1], index: 7, kind: output, shape index: {}]  }
   0x1   :  { %v110_v0 = vld [vmem:[%s1441_s1 + $0x78] sm:$0xff]  ;;  %v109_v1 = vld [vmem:[%s1441_s1 + $0x70] sm:$0xff]  ;;  %32 = vst.msk [vmem:[#allocation2 + $0x8] sm:$0xff] %vm30_vm0, %v1115_v2  ;;  %31 = vst.msk [vmem:[#allocation2] sm:$0xff] %vm30_vm0, %v1115_v2 }
   0x2   :  { %33 = vst.msk [vmem:[#allocation2 + $0x10] sm:$0xff] %vm30_vm0, %v1115_v2  ;;  %34 = vst.msk [vmem:[#allocation2 + $0x18] sm:$0xff] %vm30_vm0, %v1115_v2  ;;  %986 = vmatprep.subr.mxu0 %v110_v0  ;;  %v108_v3 = vld [vmem:[%s1441_s1 + $0x68] sm:$0xff]  ;;  %v107_v4 = vld [vmem:[%s1441_s1 + $0x60] sm:$0xff] }
   0x3   :  { %35 = vst.msk [vmem:[#allocation2 + $0x20] sm:$0xff] %vm30_vm0, %v1115_v2  ;;  %36 = vst.msk [vmem:[#allocation2 + $0x28] sm:$0xff] %vm30_vm0, %v1115_v2  ;;  %987 = vmatpush3.msra.mxu0 %v110_v0  ;;  %v876_v5 = vld [vmem:[%s1442_s0] sm:$0xff]   ;;  %v106_v6 = vld [vmem:[%s1441_s1 + $0x58] sm:$0xff] }
   0x4   :  { %37 = vst.msk [vmem:[#allocation2 + $0x30] sm:$0xff] %vm30_vm0, %v1115_v2  ;;  %38 = vst.msk [vmem:[#allocation2 + $0x38] sm:$0xff] %vm30_vm0, %v1115_v2  ;;  %988 = vmatprep.subr.mxu0 %v109_v1  ;;  %v877_v7 = vunpack.c.l.bf16 %v876_v5  ;;  %v105_v8 = vld [vmem:[%s1441_s1 + $0x50] sm:$0xff]  ;;  %v311_v9 = vld [vmem:[%s1443_s2 + $0x18] sm:$0xff]  ;;  %v878_v23 = vunpack.c.h.bf16 %v876_v5 }
   0x5   :  { %39 = vst.msk [vmem:[#allocation2 + $0x40] sm:$0xff] %vm30_vm0, %v1115_v2  ;;  %40 = vst.msk [vmem:[#allocation2 + $0x48] sm:$0xff] %vm30_vm0, %v1115_v2  ;;  %989 = vmatpush3.msra.mxu0 %v109_v1  ;;  %1106 = vmatprep.subr.mxu1 %v311_v9  ;;  %v104_v10 = vld [vmem:[%s1441_s1 + $0x48] sm:$0xff]  ;;  %v310_v11 = vld [vmem:[%s1443_s2 + $0x10] sm:$0xff] }
   0x6   :  { %41 = vst.msk [vmem:[#allocation2 + $0x50] sm:$0xff] %vm30_vm0, %v1115_v2  ;;  %42 = vst.msk [vmem:[#allocation2 + $0x58] sm:$0xff] %vm30_vm0, %v1115_v2  ;;  %990 = vmatprep.subr.mxu0 %v108_v3  ;;  %1018 = vmatprep.mubr.f32.mxu0 %v877_v7  ;;  %v103_v12 = vld [vmem:[%s1441_s1 + $0x40] sm:$0xff]  ;;  %v309_v13 = vld [vmem:[%s1443_s2 + $0x8] sm:$0xff] }
   0x7   :  { %43 = vst.msk [vmem:[#allocation2 + $0x60] sm:$0xff] %vm30_vm0, %v1115_v2  ;;  %44 = vst.msk [vmem:[#allocation2 + $0x68] sm:$0xff] %vm30_vm0, %v1115_v2  ;;  %991 = vmatpush3.msra.mxu0 %v108_v3  ;;  %1110 = vmatpush3.msra.mxu1 %v311_v9  ;;  %v102_v14 = vld [vmem:[%s1441_s1 + $0x38] sm:$0xff]  ;;  %v101_v15 = vld [vmem:[%s1441_s1 + $0x30] sm:$0xff] }
   0x8   :  { %45 = vst.msk [vmem:[#allocation2 + $0x70] sm:$0xff] %vm30_vm0, %v1115_v2  ;;  %46 = vst.msk [vmem:[#allocation2 + $0x78] sm:$0xff] %vm30_vm0, %v1115_v2  ;;  %992 = vmatprep.subr.mxu0 %v107_v4  ;;  %1107 = vmatprep.subr.mxu1 %v310_v11  ;;  %v100_v16 = vld [vmem:[%s1441_s1 + $0x28] sm:$0xff]  ;;  %v99_v17 = vld [vmem:[%s1441_s1 + $0x20] sm:$0xff] }
   0x9   :  { %993 = vmatpush3.msra.mxu0 %v107_v4  ;;  %1111 = vmatpush3.msra.mxu1 %v310_v11  ;;  %v98_v18 = vld [vmem:[%s1441_s1 + $0x18] sm:$0xff]  ;;  %v97_v19 = vld [vmem:[%s1441_s1 + $0x10] sm:$0xff]  ;;  %v96_v20 = vld [vmem:[%s1441_s1 + $0x8] sm:$0xff] }
   0xa   :  { %994 = vmatprep.subr.mxu0 %v106_v6  ;;  %1108 = vmatprep.subr.mxu1 %v309_v13  ;;  %v907_v21 = vld [vmem:[%s1442_s0 + $0x8] sm:$0xff]   ;;  %v95_v22 = vld [vmem:[%s1441_s1] sm:$0xff]  ;;  %v908_v25 = vld [vmem:[%s1442_s0 + $0x10] sm:$0xff]  }
   0xb   :  { %995 = vmatpush3.msra.mxu0 %v106_v6  ;;  %1112 = vmatpush3.msra.mxu1 %v309_v13  ;;  %v881_v24 = vunpack.c.l.bf16 %v907_v21  ;;  %v882_v26 = vunpack.c.h.bf16 %v907_v21  ;;  %v885_v27 = vunpack.c.l.bf16 %v908_v25  ;;  %v909_v28 = vld [vmem:[%s1442_s0 + $0x18] sm:$0xff]   ;;  %v886_v29 = vunpack.c.h.bf16 %v908_v25  ;;  %v910_v31 = vld [vmem:[%s1442_s0 + $0x20] sm:$0xff]   ;;  %v911_v34 = vld [vmem:[%s1442_s0 + $0x28] sm:$0xff]  }
   0xc   :  { %996 = vmatprep.subr.mxu0 %v105_v8  ;;  %v889_v30 = vunpack.c.l.bf16 %v909_v28  ;;  %v890_v32 = vunpack.c.h.bf16 %v909_v28  ;;  %v893_v33 = vunpack.c.l.bf16 %v910_v31  ;;  %v894_v35 = vunpack.c.h.bf16 %v910_v31  ;;  %v912_v37 = vld [vmem:[%s1442_s0 + $0x30] sm:$0xff]   ;;  %v913_v40 = vld [vmem:[%s1442_s0 + $0x38] sm:$0xff]   ;;  %v308_v44 = vld [vmem:[%s1443_s2] sm:$0xff] }
   0xd   :  { %997 = vmatpush3.msra.mxu0 %v105_v8  ;;  %v897_v36 = vunpack.c.l.bf16 %v911_v34  ;;  %v898_v38 = vunpack.c.h.bf16 %v911_v34  ;;  %v901_v39 = vunpack.c.l.bf16 %v912_v37  ;;  %v902_v41 = vunpack.c.h.bf16 %v912_v37  ;;  %1109 = vmatprep.subr.mxu1 %v308_v44  ;;  %v531_v45 = vld [vmem:[%s1444_s4 + $0x18] sm:$0xff]  ;;  %v80_v46 = vld [vmem:[#allocation2 + $0x8] sm:$0xff]  ;;  %v79_v48 = vld [vmem:[#allocation2] sm:$0xff] }
   0xe   :  { %998 = vmatprep.subr.mxu0 %v104_v10  ;;  %v905_v42 = vunpack.c.l.bf16 %v913_v40  ;;  %v906_v43 = vunpack.c.h.bf16 %v913_v40  ;;  %1113 = vmatpush3.msra.mxu1 %v308_v44  ;;  %v82_v51 = vld [vmem:[#allocation2 + $0x18] sm:$0xff]  ;;  %v81_v54 = vld [vmem:[#allocation2 + $0x10] sm:$0xff]  ;;  %v84_v57 = vld [vmem:[#allocation2 + $0x28] sm:$0xff] }
   0xf   :  { %999 = vmatpush3.msra.mxu0 %v104_v10  ;;  %1074 = vmatprep.subr.mxu1 %v531_v45  ;;  %v83_v60 = vld [vmem:[#allocation2 + $0x20] sm:$0xff]  ;;  %v86_v63 = vld [vmem:[#allocation2 + $0x38] sm:$0xff]  ;;  %v85_v3 = vld [vmem:[#allocation2 + $0x30] sm:$0xff] }
  0x10   :  { %1000 = vmatprep.subr.mxu0 %v103_v12  ;;  %v88_v7 = vld [vmem:[#allocation2 + $0x48] sm:$0xff] }
  0x11   :  { %1001 = vmatpush3.msra.mxu0 %v103_v12  ;;  %v92_v25 = vld [vmem:[#allocation2 + $0x68] sm:$0xff] }
  0x12   :  { %1002 = vmatprep.subr.mxu0 %v102_v14 }
  0x13   :  { %1003 = vmatpush3.msra.mxu0 %v102_v14  ;;  %v530_v14 = vld [vmem:[%s1444_s4 + $0x10] sm:$0xff] }
  0x14   :  { %1004 = vmatprep.subr.mxu0 %v101_v15 }
  0x15   :  { %1005 = vmatpush3.msra.mxu0 %v101_v15 }
  0x16   :  { %1006 = vmatprep.subr.mxu0 %v100_v16 }
  0x17   :  { %1007 = vmatpush3.msra.mxu0 %v100_v16  ;;  %v90_v16 = vld [vmem:[#allocation2 + $0x58] sm:$0xff] }
  0x18   :  { %1008 = vmatprep.subr.mxu0 %v99_v17 }
  0x19   :  { %1009 = vmatpush3.msra.mxu0 %v99_v17 }
  0x1a   :  { %1010 = vmatprep.subr.mxu0 %v98_v18 }
  0x1b   :  { %1011 = vmatpush3.msra.mxu0 %v98_v18 }
  0x1c   :  { %1012 = vmatprep.subr.mxu0 %v97_v19 }
  0x1d   :  { %1013 = vmatpush3.msra.mxu0 %v97_v19  ;;  %v529_v19 = vld [vmem:[%s1444_s4 + $0x8] sm:$0xff] }
  0x1e   :  { %1014 = vmatprep.subr.mxu0 %v96_v20 }
  0x1f   :  { %1015 = vmatpush3.msra.mxu0 %v96_v20 }
  0x20   :  { %1016 = vmatprep.subr.mxu0 %v95_v22 }
  0x21   :  { %1017 = vmatpush3.msra.mxu0 %v95_v22  ;;  %v89_v22 = vld [vmem:[#allocation2 + $0x50] sm:$0xff] }
  0x22   :  { %1019 = vmatmul.mubr.f32.vlgmr.msra.gmra.mxu0 %v878_v23  ;;  %1042 = vmatprep.subr.mxu0 %v311_v9 }
  0x23   :  { %1021 = vmatprep.mubr.f32.mxu0 %v881_v24  ;;  %1043 = vmatpush3.msra.mxu0 %v311_v9 }
  0x24   :  { %1044 = vmatprep.subr.mxu0 %v310_v11 }
  0x25   :  { %1045 = vmatpush3.msra.mxu0 %v310_v11  ;;  %v87_v11 = vld [vmem:[#allocation2 + $0x40] sm:$0xff] }
  0x26   :  { %1022 = vmatmul.mubr.f32.gmra.mxu0 %v882_v26  ;;  %1046 = vmatprep.subr.mxu0 %v309_v13 }
  0x27   :  { %1024 = vmatprep.mubr.f32.mxu0 %v885_v27  ;;  %1047 = vmatpush3.msra.mxu0 %v309_v13 }
  0x28   :  { %1048 = vmatprep.subr.mxu0 %v308_v44 }
  0x29   :  { %1049 = vmatpush3.msra.mxu0 %v308_v44 }
  0x2a   :  { %1025 = vmatmul.mubr.f32.gmra.mxu0 %v886_v29 }
  0x2b   :  { %1027 = vmatprep.mubr.f32.mxu0 %v889_v30  ;;  %v91_v30 = vld [vmem:[#allocation2 + $0x60] sm:$0xff] }
  0x2e   :  { %1028 = vmatmul.mubr.f32.gmra.mxu0 %v890_v32 }
  0x2f   :  { %1030 = vmatprep.mubr.f32.mxu0 %v893_v33  ;;  %v94_v33 = vld [vmem:[#allocation2 + $0x78] sm:$0xff] }
  0x32   :  { %1031 = vmatmul.mubr.f32.gmra.mxu0 %v894_v35 }
  0x33   :  { %1033 = vmatprep.mubr.f32.mxu0 %v897_v36 }
  0x36   :  { %1034 = vmatmul.mubr.f32.gmra.mxu0 %v898_v38  ;;  %v93_v38 = vld [vmem:[#allocation2 + $0x70] sm:$0xff] }
  0x37   :  { %1036 = vmatprep.mubr.f32.mxu0 %v901_v39 }
  0x3a   :  { %1037 = vmatmul.mubr.f32.gmra.mxu0 %v902_v41 }
  0x3b   :  { %1039 = vmatprep.mubr.f32.mxu0 %v905_v42 }
  0x3e   :  { %1040 = vmatmul.mubr.f32.gmra.mxu0 %v906_v43 }
  0xe2   :  { %v1020_v47 = vpop.f32.mrf.mxu0 }
  0xe3   :  { %v257_v49 = vadd.f32 %v1020_v47, %v80_v46 }
  0xe4   :  { %v177_v50 = vpop.f32.mrf.mxu0 }
  0xe5   :  { %274 = vst.msk [vmem:[#allocation2 + $0x8] sm:$0xff] %vm30_vm0, %v257_v49  ;;  %v256_v52 = vadd.f32 %v177_v50, %v79_v48  ;;  %v528_v48 = vld [vmem:[%s1444_s4] sm:$0xff] }
  0xe6   :  { %v1023_v53 = vpop.f32.mrf.mxu0  ;;  %v840_v49 = vld [vmem:[%s1445_s3] ss:$0 sm:$0xff] }
  0xe7   :  { %273 = vst.msk [vmem:[#allocation2] sm:$0xff] %vm30_vm0, %v256_v52  ;;  %v259_v55 = vadd.f32 %v1023_v53, %v82_v51 }
  0xe8   :  { %v187_v56 = vpop.f32.mrf.mxu0 }
  0xe9   :  { %276 = vst.msk [vmem:[#allocation2 + $0x18] sm:$0xff] %vm30_vm0, %v259_v55  ;;  %v258_v58 = vadd.f32 %v187_v56, %v81_v54 }
  0xea   :  { %v1026_v59 = vpop.f32.mrf.mxu0 }
  0xeb   :  { %275 = vst.msk [vmem:[#allocation2 + $0x10] sm:$0xff] %vm30_vm0, %v258_v58  ;;  %v261_v61 = vadd.f32 %v1026_v59, %v84_v57 }
  0xec   :  { %v197_v62 = vpop.f32.mrf.mxu0  ;;  %v293_v5 = vld [vmem:[#allocation2 + $0x8] sm:$0xff] }
  0xed   :  { %278 = vst.msk [vmem:[#allocation2 + $0x28] sm:$0xff] %vm30_vm0, %v261_v61  ;;  %v260_v0 = vadd.f32 %v197_v62, %v83_v60 }
  0xee   :  { %v1029_v1 = vpop.f32.mrf.mxu0  ;;  %v292_v2 = vld [vmem:[#allocation2] sm:$0xff] }
  0xef   :  { %277 = vst.msk [vmem:[#allocation2 + $0x20] sm:$0xff] %vm30_vm0, %v260_v0  ;;  %v263_v4 = vadd.f32 %v1029_v1, %v86_v63  ;;  %1050 = vmatprep.mubr.msk.f32.mxu0 %vm30_vm0, %v292_v2 }
  0xf0   :  { %v207_v6 = vpop.f32.mrf.mxu0  ;;  %1051 = vmatmul.mubr.msk.f32.vlgmr.msra.gmra.mxu0 %vm30_vm0, %v293_v5  ;;  %v295_v13 = vld [vmem:[#allocation2 + $0x18] sm:$0xff] }
  0xf1   :  { %280 = vst.msk [vmem:[#allocation2 + $0x38] sm:$0xff] %vm30_vm0, %v263_v4  ;;  %v262_v8 = vadd.f32 %v207_v6, %v85_v3 }
  0xf2   :  { %v1032_v9 = vpop.f32.mrf.mxu0  ;;  %v294_v10 = vld [vmem:[#allocation2 + $0x10] sm:$0xff] }
  0xf3   :  { %279 = vst.msk [vmem:[#allocation2 + $0x30] sm:$0xff] %vm30_vm0, %v262_v8  ;;  %v265_v12 = vadd.f32 %v1032_v9, %v88_v7  ;;  %1053 = vmatprep.mubr.msk.f32.mxu1 %vm30_vm0, %v294_v10 }
  0xf4   :  { %v217_v15 = vpop.f32.mrf.mxu0  ;;  %1054 = vmatmul.mubr.msk.f32.vlgmr.msra.gmra.mxu1 %vm30_vm0, %v295_v13  ;;  %v297_v18 = vld [vmem:[#allocation2 + $0x28] sm:$0xff] }
  0xf5   :  { %282 = vst.msk [vmem:[#allocation2 + $0x48] sm:$0xff] %vm30_vm0, %v265_v12  ;;  %v264_v17 = vadd.f32 %v217_v15, %v87_v11  ;;  %1075 = vmatpush3.msra.mxu1 %v531_v45 }
  0xf6   :  { %v1035_v20 = vpop.f32.mrf.mxu0  ;;  %v296_v21 = vld [vmem:[#allocation2 + $0x20] sm:$0xff]  ;;  %1076 = vmatprep.subr.mxu1 %v530_v14 }
  0xf7   :  { %281 = vst.msk [vmem:[#allocation2 + $0x40] sm:$0xff] %vm30_vm0, %v264_v17  ;;  %v267_v23 = vadd.f32 %v1035_v20, %v90_v16  ;;  %1056 = vmatprep.mubr.msk.f32.mxu1 %vm30_vm0, %v296_v21  ;;  %1077 = vmatpush3.msra.mxu1 %v530_v14 }
  0xf8   :  { %v227_v24 = vpop.f32.mrf.mxu0  ;;  %1057 = vmatmul.mubr.msk.f32.gmra.mxu1 %vm30_vm0, %v297_v18  ;;  %1078 = vmatprep.subr.mxu1 %v529_v19  ;;  %v299_v27 = vld [vmem:[#allocation2 + $0x38] sm:$0xff] }
  0xf9   :  { %284 = vst.msk [vmem:[#allocation2 + $0x58] sm:$0xff] %vm30_vm0, %v267_v23  ;;  %v266_v26 = vadd.f32 %v227_v24, %v89_v22  ;;  %1079 = vmatpush3.msra.mxu1 %v529_v19 }
  0xfa   :  { %v1038_v28 = vpop.f32.mrf.mxu0  ;;  %v298_v29 = vld [vmem:[#allocation2 + $0x30] sm:$0xff]  ;;  %1080 = vmatprep.subr.mxu1 %v528_v48 }
  0xfb   :  { %283 = vst.msk [vmem:[#allocation2 + $0x50] sm:$0xff] %vm30_vm0, %v266_v26  ;;  %v269_v31 = vadd.f32 %v1038_v28, %v92_v25  ;;  %1059 = vmatprep.mubr.msk.f32.mxu1 %vm30_vm0, %v298_v29  ;;  %1081 = vmatpush3.msra.mxu1 %v528_v48 }
  0xfc   :  { %v237_v32 = vpop.f32.mrf.mxu0  ;;  %1060 = vmatmul.mubr.msk.f32.gmra.mxu1 %vm30_vm0, %v299_v27  ;;  %v301_v35 = vld [vmem:[#allocation2 + $0x48] sm:$0xff] }
  0xfd   :  { %286 = vst.msk [vmem:[#allocation2 + $0x68] sm:$0xff] %vm30_vm0, %v269_v31  ;;  %v268_v34 = vadd.f32 %v237_v32, %v91_v30 }
  0xfe   :  { %v1041_v36 = vpop.f32.mrf.mxu0  ;;  %v300_v37 = vld [vmem:[#allocation2 + $0x40] sm:$0xff] }
  0xff   :  { %285 = vst.msk [vmem:[#allocation2 + $0x60] sm:$0xff] %vm30_vm0, %v268_v34  ;;  %v271_v39 = vadd.f32 %v1041_v36, %v94_v33  ;;  %1062 = vmatprep.mubr.msk.f32.mxu1 %vm30_vm0, %v300_v37  ;;  %v1322_v34 = vld [vmem:[%s1446_s5] ss:$0 sm:$0xff] }
 0x100   :  { %v247_v40 = vpop.f32.mrf.mxu0  ;;  %1063 = vmatmul.mubr.msk.f32.gmra.mxu1 %vm30_vm0, %v301_v35  ;;  %v303_v42 = vld [vmem:[#allocation2 + $0x58] sm:$0xff] }
 0x101   :  { %288 = vst.msk [vmem:[#allocation2 + $0x78] sm:$0xff] %vm30_vm0, %v271_v39  ;;  %v270_v41 = vadd.f32 %v247_v40, %v93_v38  ;;  %v1328_v38 = vld [vmem:[%s1447_s6] ss:$0 sm:$0xff] }
 0x102   :  { %v302_v43 = vld [vmem:[#allocation2 + $0x50] sm:$0xff] }
 0x103   :  { %287 = vst.msk [vmem:[#allocation2 + $0x70] sm:$0xff] %vm30_vm0, %v270_v41  ;;  %1065 = vmatprep.mubr.msk.f32.mxu1 %vm30_vm0, %v302_v43 }
 0x104   :  { %1066 = vmatmul.mubr.msk.f32.gmra.mxu1 %vm30_vm0, %v303_v42  ;;  %v305_v44 = vld [vmem:[#allocation2 + $0x68] sm:$0xff] }
 0x106   :  { %v304_v45 = vld [vmem:[#allocation2 + $0x60] sm:$0xff] }
 0x107   :  { %1068 = vmatprep.mubr.msk.f32.mxu1 %vm30_vm0, %v304_v45 }
 0x108   :  { %1069 = vmatmul.mubr.msk.f32.gmra.mxu1 %vm30_vm0, %v305_v44  ;;  %v307_v46 = vld [vmem:[#allocation2 + $0x78] sm:$0xff] }
 0x10a   :  { %v306_v47 = vld [vmem:[#allocation2 + $0x70] sm:$0xff] }
 0x10b   :  { %1071 = vmatprep.mubr.msk.f32.mxu1 %vm30_vm0, %v306_v47 }
 0x10c   :  { %1072 = vmatmul.mubr.msk.f32.gmra.mxu1 %vm30_vm0, %v307_v46 }
 0x1b0   :  { %v1052_v50 = vpop.f32.mrf.mxu0 }
 0x1b1   :  { %v439_v51 = vadd.f32 %v1052_v50, %v840_v49 }
 0x1b2   :  { %v433_v52 = vpop.f32.mrf.mxu0 }
 0x1b3   :  { %v434_v53 = vadd.f32 %v840_v49, %v433_v52  ;;  %v513_v56 = vmax.f32 %v439_v51, 0.0 }
 0x1b4   :  { %v1055_v54 = vpop.f32.mrf.mxu1 }
 0x1b5   :  { %v512_v55 = vmax.f32 %v434_v53, 0.0  ;;  %v449_v57 = vadd.f32 %v1055_v54, %v840_v49 }
 0x1b6   :  { %v443_v58 = vpop.f32.mrf.mxu1 }
 0x1b7   :  { %v444_v59 = vadd.f32 %v840_v49, %v443_v58  ;;  %1082 = vmatprep.mubr.msk.f32.mxu1 %vm30_vm0, %v512_v55  ;;  %v515_v62 = vmax.f32 %v449_v57, 0.0 }
 0x1b8   :  { %v1058_v60 = vpop.f32.mrf.mxu1  ;;  %1083 = vmatmul.mubr.msk.f32.vlgmr.msra.gmra.mxu1 %vm30_vm0, %v513_v56 }
 0x1b9   :  { %v514_v61 = vmax.f32 %v444_v59, 0.0  ;;  %v459_v63 = vadd.f32 %v1058_v60, %v840_v49 }
 0x1ba   :  { %v453_v0 = vpop.f32.mrf.mxu1 }
 0x1bb   :  { %v454_v1 = vadd.f32 %v840_v49, %v453_v0  ;;  %1085 = vmatprep.mubr.msk.f32.mxu1 %vm30_vm0, %v514_v61  ;;  %v517_v4 = vmax.f32 %v459_v63, 0.0 }
 0x1bc   :  { %v1061_v2 = vpop.f32.mrf.mxu1  ;;  %1086 = vmatmul.mubr.msk.f32.gmra.mxu1 %vm30_vm0, %v515_v62 }
 0x1bd   :  { %v516_v3 = vmax.f32 %v454_v1, 0.0  ;;  %v469_v5 = vadd.f32 %v1061_v2, %v840_v49 }
 0x1be   :  { %v463_v6 = vpop.f32.mrf.mxu1 }
 0x1bf   :  { %v464_v7 = vadd.f32 %v840_v49, %v463_v6  ;;  %1088 = vmatprep.mubr.msk.f32.mxu1 %vm30_vm0, %v516_v3  ;;  %v519_v10 = vmax.f32 %v469_v5, 0.0 }
 0x1c0   :  { %v1064_v8 = vpop.f32.mrf.mxu1  ;;  %1089 = vmatmul.mubr.msk.f32.gmra.mxu1 %vm30_vm0, %v517_v4 }
 0x1c1   :  { %v518_v9 = vmax.f32 %v464_v7, 0.0  ;;  %v479_v11 = vadd.f32 %v1064_v8, %v840_v49 }
 0x1c2   :  { %v473_v12 = vpop.f32.mrf.mxu1 }
 0x1c3   :  { %v474_v13 = vadd.f32 %v840_v49, %v473_v12  ;;  %1091 = vmatprep.mubr.msk.f32.mxu1 %vm30_vm0, %v518_v9  ;;  %v521_v16 = vmax.f32 %v479_v11, 0.0 }
 0x1c4   :  { %v1067_v14 = vpop.f32.mrf.mxu1  ;;  %1092 = vmatmul.mubr.msk.f32.gmra.mxu1 %vm30_vm0, %v519_v10 }
 0x1c5   :  { %v520_v15 = vmax.f32 %v474_v13, 0.0  ;;  %v489_v17 = vadd.f32 %v1067_v14, %v840_v49 }
 0x1c6   :  { %v483_v18 = vpop.f32.mrf.mxu1 }
 0x1c7   :  { %v484_v19 = vadd.f32 %v840_v49, %v483_v18  ;;  %1094 = vmatprep.mubr.msk.f32.mxu1 %vm30_vm0, %v520_v15  ;;  %v523_v22 = vmax.f32 %v489_v17, 0.0 }
 0x1c8   :  { %v1070_v20 = vpop.f32.mrf.mxu1  ;;  %1095 = vmatmul.mubr.msk.f32.gmra.mxu1 %vm30_vm0, %v521_v16 }
 0x1c9   :  { %v522_v21 = vmax.f32 %v484_v19, 0.0  ;;  %v499_v23 = vadd.f32 %v1070_v20, %v840_v49 }
 0x1ca   :  { %v493_v24 = vpop.f32.mrf.mxu1 }
 0x1cb   :  { %v494_v25 = vadd.f32 %v840_v49, %v493_v24  ;;  %1097 = vmatprep.mubr.msk.f32.mxu1 %vm30_vm0, %v522_v21  ;;  %v525_v28 = vmax.f32 %v499_v23, 0.0 }
 0x1cc   :  { %v1073_v26 = vpop.f32.mrf.mxu1  ;;  %1098 = vmatmul.mubr.msk.f32.gmra.mxu1 %vm30_vm0, %v523_v22 }
 0x1cd   :  { %v524_v27 = vmax.f32 %v494_v25, 0.0  ;;  %v509_v29 = vadd.f32 %v1073_v26, %v840_v49 }
 0x1ce   :  { %v503_v30 = vpop.f32.mrf.mxu1 }
 0x1cf   :  { %v504_v31 = vadd.f32 %v840_v49, %v503_v30  ;;  %1100 = vmatprep.mubr.msk.f32.mxu1 %vm30_vm0, %v524_v27  ;;  %v527_v33 = vmax.f32 %v509_v29, 0.0 }
 0x1d0   :  { %1101 = vmatmul.mubr.msk.f32.gmra.mxu1 %vm30_vm0, %v525_v28 }
 0x1d1   :  { %v526_v32 = vmax.f32 %v504_v31, 0.0 }
 0x1d3   :  { %1103 = vmatprep.mubr.msk.f32.mxu1 %vm30_vm0, %v526_v32 }
 0x1d4   :  { %1104 = vmatmul.mubr.msk.f32.gmra.mxu1 %vm30_vm0, %v527_v33 }
 0x278   :  { %v1084_v35 = vpop.f32.mrf.mxu1 }
 0x279   :  { %v659_v36 = vadd.f32 %v1084_v35, %v1322_v34 }
 0x27a   :  { %v653_v37 = vpop.f32.mrf.mxu1 }
 0x27b   :  { %v733_v39 = vmax.f32 %v659_v36, 0.0  ;;  %v654_v40 = vadd.f32 %v1322_v34, %v653_v37 }
 0x27c   :  { %v1087_v41 = vpop.f32.mrf.mxu1 }
 0x27d   :  { %v732_v42 = vmax.f32 %v654_v40, 0.0  ;;  %v669_v43 = vadd.f32 %v1087_v41, %v1322_v34  ;;  %v756_v44 = vmul.f32 %v1328_v38, %v733_v39 }
 0x27e   :  { %v663_v45 = vpop.f32.mrf.mxu1 }
 0x27f   :  { %v735_v46 = vmax.f32 %v669_v43, 0.0  ;;  %v664_v47 = vadd.f32 %v1322_v34, %v663_v45  ;;  %v774_v48 = vsel %vm30_vm0, %v756_v44, 0.0  ;;  %v755_v49 = vmul.f32 %v1328_v38, %v732_v42 }
 0x280   :  { %775 = vadd.xlane.f32.xlu0 %v774_v48  ;;  %v1090_v50 = vpop.f32.mrf.mxu1 }
 0x281   :  { %v734_v51 = vmax.f32 %v664_v47, 0.0  ;;  %v679_v52 = vadd.f32 %v1090_v50, %v1322_v34  ;;  %v758_v53 = vmul.f32 %v1328_v38, %v735_v46  ;;  %v771_v55 = vsel %vm30_vm0, %v755_v49, 0.0 }
 0x282   :  { %v673_v54 = vpop.f32.mrf.mxu1 }
 0x283   :  { %v737_v56 = vmax.f32 %v679_v52, 0.0  ;;  %v674_v57 = vadd.f32 %v1322_v34, %v673_v54  ;;  %v780_v58 = vsel %vm30_vm0, %v758_v53, 0.0  ;;  %v757_v59 = vmul.f32 %v1328_v38, %v734_v51 }
 0x284   :  { %781 = vadd.xlane.f32.xlu1 %v780_v58  ;;  %v1093_v60 = vpop.f32.mrf.mxu1  ;;  %772 = vadd.xlane.f32.xlu0 %v771_v55 }
 0x285   :  { %v736_v61 = vmax.f32 %v674_v57, 0.0  ;;  %v689_v62 = vadd.f32 %v1093_v60, %v1322_v34  ;;  %v777_v0 = vsel %vm30_vm0, %v757_v59, 0.0  ;;  %v760_v4 = vmul.f32 %v1328_v38, %v737_v56 }
 0x286   :  { %v683_v63 = vpop.f32.mrf.mxu1 }
 0x287   :  { %v739_v1 = vmax.f32 %v689_v62, 0.0  ;;  %v684_v2 = vadd.f32 %v1322_v34, %v683_v63  ;;  %v759_v3 = vmul.f32 %v1328_v38, %v736_v61  ;;  %v786_v13 = vsel %vm30_vm0, %v760_v4, 0.0 }
 0x288   :  { %v1096_v5 = vpop.f32.mrf.mxu1  ;;  %778 = vadd.xlane.f32.xlu1 %v777_v0 }
 0x289   :  { %v738_v6 = vmax.f32 %v684_v2, 0.0  ;;  %v699_v7 = vadd.f32 %v1096_v5, %v1322_v34  ;;  %v783_v8 = vsel %vm30_vm0, %v759_v3, 0.0  ;;  %v762_v10 = vmul.f32 %v1328_v38, %v739_v1 }
 0x28a   :  { %v693_v9 = vpop.f32.mrf.mxu1  ;;  %784 = vadd.xlane.f32.xlu0 %v783_v8 }
 0x28b   :  { %v741_v11 = vmax.f32 %v699_v7, 0.0  ;;  %v694_v12 = vadd.f32 %v1322_v34, %v693_v9  ;;  %v761_v14 = vmul.f32 %v1328_v38, %v738_v6  ;;  %v792_v20 = vsel %vm30_vm0, %v762_v10, 0.0 }
 0x28c   :  { %v1099_v15 = vpop.f32.mrf.mxu1  ;;  %787 = vadd.xlane.f32.xlu1 %v786_v13 }
 0x28d   :  { %v740_v16 = vmax.f32 %v694_v12, 0.0  ;;  %v709_v17 = vadd.f32 %v1099_v15, %v1322_v34  ;;  %v789_v18 = vsel %vm30_vm0, %v761_v14, 0.0  ;;  %v764_v24 = vmul.f32 %v1328_v38, %v741_v11 }
 0x28e   :  { %v703_v19 = vpop.f32.mrf.mxu1  ;;  %790 = vadd.xlane.f32.xlu0 %v789_v18 }
 0x28f   :  { %v743_v21 = vmax.f32 %v709_v17, 0.0  ;;  %v704_v22 = vadd.f32 %v1322_v34, %v703_v19  ;;  %v763_v23 = vmul.f32 %v1328_v38, %v740_v16  ;;  %v798_v33 = vsel %vm30_vm0, %v764_v24, 0.0 }
 0x290   :  { %v1102_v25 = vpop.f32.mrf.mxu1  ;;  %793 = vadd.xlane.f32.xlu1 %v792_v20 }
 0x291   :  { %v742_v26 = vmax.f32 %v704_v22, 0.0  ;;  %v719_v27 = vadd.f32 %v1102_v25, %v1322_v34  ;;  %v795_v28 = vsel %vm30_vm0, %v763_v23, 0.0  ;;  %v766_v30 = vmul.f32 %v1328_v38, %v743_v21 }
 0x292   :  { %v713_v29 = vpop.f32.mrf.mxu1  ;;  %796 = vadd.xlane.f32.xlu0 %v795_v28 }
 0x293   :  { %v745_v31 = vmax.f32 %v719_v27, 0.0  ;;  %v714_v32 = vadd.f32 %v1322_v34, %v713_v29  ;;  %v765_v35 = vmul.f32 %v1328_v38, %v742_v26  ;;  %v804_v42 = vsel %vm30_vm0, %v766_v30, 0.0 }
 0x294   :  { %799 = vadd.xlane.f32.xlu1 %v798_v33  ;;  %v1105_v36 = vpop.f32.mrf.mxu1 }
 0x295   :  { %v744_v37 = vmax.f32 %v714_v32, 0.0  ;;  %v729_v39 = vadd.f32 %v1105_v36, %v1322_v34  ;;  %v801_v40 = vsel %vm30_vm0, %v765_v35, 0.0  ;;  %v768_v46 = vmul.f32 %v1328_v38, %v745_v31 }
 0x296   :  { %802 = vadd.xlane.f32.xlu0 %v801_v40  ;;  %v723_v41 = vpop.f32.mrf.mxu1 }
 0x297   :  { %v747_v43 = vmax.f32 %v729_v39, 0.0  ;;  %v724_v44 = vadd.f32 %v1322_v34, %v723_v41  ;;  %v767_v45 = vmul.f32 %v1328_v38, %v744_v37  ;;  %v810_v49 = vsel %vm30_vm0, %v768_v46, 0.0 }
 0x298   :  { %805 = vadd.xlane.f32.xlu1 %v804_v42 }
 0x299   :  { %v746_v47 = vmax.f32 %v724_v44, 0.0  ;;  %v807_v48 = vsel %vm30_vm0, %v767_v45, 0.0  ;;  %v770_v51 = vmul.f32 %v1328_v38, %v747_v43 }
 0x29a   :  { %808 = vadd.xlane.f32.xlu0 %v807_v48 }
 0x29b   :  { %v769_v50 = vmul.f32 %v1328_v38, %v746_v47  ;;  %v816_v34 = vsel %vm30_vm0, %v770_v51, 0.0 }
 0x29c   :  { %811 = vadd.xlane.f32.xlu1 %v810_v49 }
 0x29d   :  { %v813_v52 = vsel %vm30_vm0, %v769_v50, 0.0 }
 0x29e   :  { %814 = vadd.xlane.f32.xlu0 %v813_v52 }
 0x2a0   :  { %817 = vadd.xlane.f32.xlu1 %v816_v34 }
 0x309   :  { %v776_v53 = vpop.xlane.xlu0 %775 }
 0x30a   :  { %821 = vst.msk [vmem:[%s1448_s7 + $0x8] sm:$0xff] %vm819_vm1, %v776_v53 }
 0x30d   :  { %v782_v54 = vpop.xlane.xlu1 %781  ;;  %v773_v55 = vpop.xlane.xlu0 %772 }
 0x30e   :  { %823 = vst.msk [vmem:[%s1448_s7 + $0x18] sm:$0xff] %vm819_vm1, %v782_v54  ;;  %820 = vst.msk [vmem:[%s1448_s7] sm:$0xff] %vm819_vm1, %v773_v55 }
 0x311   :  { %v779_v38 = vpop.xlane.xlu1 %778 }
 0x312   :  { %822 = vst.msk [vmem:[%s1448_s7 + $0x10] sm:$0xff] %vm819_vm1, %v779_v38 }
 0x313   :  { %v785_v56 = vpop.xlane.xlu0 %784 }
 0x314   :  { %824 = vst.msk [vmem:[%s1448_s7 + $0x20] sm:$0xff] %vm819_vm1, %v785_v56 }
 0x315   :  { %v788_v57 = vpop.xlane.xlu1 %787 }
 0x316   :  { %825 = vst.msk [vmem:[%s1448_s7 + $0x28] sm:$0xff] %vm819_vm1, %v788_v57 }
 0x317   :  { %v791_v58 = vpop.xlane.xlu0 %790 }
 0x318   :  { %826 = vst.msk [vmem:[%s1448_s7 + $0x30] sm:$0xff] %vm819_vm1, %v791_v58 }
 0x319   :  { %v794_v59 = vpop.xlane.xlu1 %793 }
 0x31a   :  { %827 = vst.msk [vmem:[%s1448_s7 + $0x38] sm:$0xff] %vm819_vm1, %v794_v59 }
 0x31b   :  { %v797_v60 = vpop.xlane.xlu0 %796 }
 0x31c   :  { %828 = vst.msk [vmem:[%s1448_s7 + $0x40] sm:$0xff] %vm819_vm1, %v797_v60 }
 0x31d   :  { %v800_v61 = vpop.xlane.xlu1 %799 }
 0x31e   :  { %829 = vst.msk [vmem:[%s1448_s7 + $0x48] sm:$0xff] %vm819_vm1, %v800_v61 }
 0x31f   :  { %v803_v62 = vpop.xlane.xlu0 %802 }
 0x320   :  { %830 = vst.msk [vmem:[%s1448_s7 + $0x50] sm:$0xff] %vm819_vm1, %v803_v62 }
 0x321   :  { %v806_v63 = vpop.xlane.xlu1 %805 }
 0x322   :  { %831 = vst.msk [vmem:[%s1448_s7 + $0x58] sm:$0xff] %vm819_vm1, %v806_v63 }
 0x323   :  { %v809_v0 = vpop.xlane.xlu0 %808 }
 0x324   :  { %832 = vst.msk [vmem:[%s1448_s7 + $0x60] sm:$0xff] %vm819_vm1, %v809_v0 }
 0x325   :  { %v812_v1 = vpop.xlane.xlu1 %811 }
 0x326   :  { %833 = vst.msk [vmem:[%s1448_s7 + $0x68] sm:$0xff] %vm819_vm1, %v812_v1 }
 0x327   :  { %v815_v2 = vpop.xlane.xlu0 %814 }
 0x328   :  { %834 = vst.msk [vmem:[%s1448_s7 + $0x70] sm:$0xff] %vm819_vm1, %v815_v2 }
 0x329   :  { %v818_v3 = vpop.xlane.xlu1 %817 }
 0x32a   :  { %835 = vst.msk [vmem:[%s1448_s7 + $0x78] sm:$0xff] %vm819_vm1, %v818_v3 }

// kernel: node_drop_forward.3
= control target key start
LH: loop header
LB: loop body
LE: loop exit
PB: predicated region body
PF: predicated region fallthrough
CT: control target
= control target key end

     0   :  { %12 = vsyncpa [#allocation5], 0  ;;  %s1361_s0 = inlined_call_operand.vmem [shape: f32[3], index: 0, kind: input, shape index: {}]   ;;  %s1362_s1 = inlined_call_operand.vmem [shape: bf16[128,128], index: 1, kind: input, shape index: {}]   ;;  %s1363_s2 = inlined_call_operand.vmem [shape: f32[128,1], index: 2, kind: input, shape index: {}]   ;;  %s1364_s3 = inlined_call_operand.vmem [shape: f32[128,32], index: 3, kind: input, shape index: {}]   ;;  %s1365_s4 = inlined_call_operand.vmem [shape: f32[2,128], index: 4, kind: input, shape index: {}]   ;;  %s1366_s5 = inlined_call_operand.vmem [shape: f32[128,32], index: 5, kind: output, shape index: {0}]   ;;  %s1367_s6 = inlined_call_operand.hbm [shape: f32[1,2,32], index: 6, kind: output, shape index: {1}]  }
   0x1   :  { %13 = vsyncpa [#allocation4], 0  ;;  %s20_s23 = sshll.u32 %s1361_s0, 4  ;;  %s21_s23 = int_to_ptr.vmem [resolvable:$true] %s20_s23 }
   0x2   :  { %s973_s24 = scalar_lea.vmem %s21_s23, 16  ;;  %p978_p1 = scmp.lt.s32.totalorder %s21_s23, %s21_s23 }
   0x3   :  { %p974_p0 = scmp.ne.s32.totalorder %s21_s23, %s973_s24  ;;  %p979_p2 = scmp.lt.s32.totalorder %s973_s24, %s973_s24 }
   0x5   :  { %p980_p3 = por %p979_p2, %p978_p1 }
   0x7   :  { %p981_p4 = pnand %p980_p3, %p974_p0 }
   0x9   :  { %984 = shalt.err (!%p981_p4)
}
   0xa   :  { %s1009_s25 = smov [#allocation3]  }
   0xb   :  { %23 = dma.vmem_to_smem %s21_s23, 16, %s1009_s25, [#allocation5]  }
   0xc   :  { %1005 = dma.done.wait [#allocation5], 16  }
   0xd   :  { %1006 = vsyncadd [#allocation5], 4294967280 }
   0xe   :  { %35 = sfence }
   0xf   :  { %v120_v0 = vld [vmem:[%s1363_s2 + $0x78] sm:$0xff]  ;;  %v119_v1 = vld [vmem:[%s1363_s2 + $0x70] sm:$0xff]  ;;  %vm40_vm0 = vcmask 7168   ;;  %v1010_v2 = vmov 0.0   ;;  %v118_v3 = vld [vmem:[%s1363_s2 + $0x68] sm:$0xff]  ;;  %v1011_v41 = vmov 0  }
  0x10   :  { %811 = vmatprep.subr.mxu0 %v120_v0  ;;  %42 = vst.msk [vmem:[#allocation2 + $0x8] sm:$0xff] %vm40_vm0, %v1010_v2  ;;  %41 = vst.msk [vmem:[#allocation2] sm:$0xff] %vm40_vm0, %v1010_v2  ;;  %867 = vmatprep.subr.mxu1 %v1010_v2  ;;  %v117_v4 = vld [vmem:[%s1363_s2 + $0x60] sm:$0xff]  ;;  %v116_v6 = vld [vmem:[%s1363_s2 + $0x58] sm:$0xff]  ;;  %s705_s23 = sld [smem:[#allocation3 + $0x1]]  ;;  %vm1012_vm1 = vmmov 0  }
  0x11   :  { %43 = vst.msk [vmem:[#allocation2 + $0x10] sm:$0xff] %vm40_vm0, %v1010_v2  ;;  %44 = vst.msk [vmem:[#allocation2 + $0x18] sm:$0xff] %vm40_vm0, %v1010_v2  ;;  %812 = vmatpush3.msra.mxu0 %v120_v0  ;;  %v724_v5 = vld [vmem:[%s1362_s1] sm:$0xff]   ;;  %v115_v8 = vld [vmem:[%s1363_s2 + $0x50] sm:$0xff]  ;;  %908 = vset.pattern.permute.xlu1 %v1011_v41  ;;  %s706_s24 = sld [smem:[#allocation3 + $0x2]]  ;;  %vm596_vm2 = vcmask 261120  }
  0x12   :  { %45 = vst.msk [vmem:[#allocation2 + $0x20] sm:$0xff] %vm40_vm0, %v1010_v2  ;;  %46 = vst.msk [vmem:[#allocation2 + $0x28] sm:$0xff] %vm40_vm0, %v1010_v2  ;;  %813 = vmatprep.subr.mxu0 %v119_v1  ;;  %v725_v7 = vunpack.c.l.bf16 %v724_v5  ;;  %v114_v9 = vld [vmem:[%s1363_s2 + $0x48] sm:$0xff]  ;;  %v113_v10 = vld [vmem:[%s1363_s2 + $0x40] sm:$0xff]  ;;  %v726_v20 = vunpack.c.h.bf16 %v724_v5  ;;  %907 = vset.pattern.permute.xlu0 %v1011_v41  ;;  %s1013_s11 = smov [#allocation6]   ;;  %vm684_vm3 = vcmask 254976  }
  0x13   :  { %47 = vst.msk [vmem:[#allocation2 + $0x30] sm:$0xff] %vm40_vm0, %v1010_v2  ;;  %48 = vst.msk [vmem:[#allocation2 + $0x38] sm:$0xff] %vm40_vm0, %v1010_v2  ;;  %814 = vmatpush3.msra.mxu0 %v119_v1  ;;  %v112_v11 = vld [vmem:[%s1363_s2 + $0x38] sm:$0xff]  ;;  %v111_v12 = vld [vmem:[%s1363_s2 + $0x30] sm:$0xff]  ;;  %899 = vmatprep.mubr.msk.f32.mxu1 %vm1012_vm1, %v1010_v2  ;;  %s694_s12 = sshll.u32 %s1013_s11, 4  ;;  %s695_s12 = int_to_ptr.vmem [resolvable:$true] %s694_s12 }
  0x14   :  { %49 = vst.msk [vmem:[#allocation2 + $0x40] sm:$0xff] %vm40_vm0, %v1010_v2  ;;  %50 = vst.msk [vmem:[#allocation2 + $0x48] sm:$0xff] %vm40_vm0, %v1010_v2  ;;  %815 = vmatprep.subr.mxu0 %v118_v3  ;;  %843 = vmatprep.mubr.f32.mxu0 %v725_v7  ;;  %v110_v13 = vld [vmem:[%s1363_s2 + $0x28] sm:$0xff]  ;;  %v109_v14 = vld [vmem:[%s1363_s2 + $0x20] sm:$0xff]  ;;  %p990_p6 = scmp.lt.s32.totalorder %s695_s12, %s695_s12 }
  0x15   :  { %51 = vst.msk [vmem:[#allocation2 + $0x50] sm:$0xff] %vm40_vm0, %v1010_v2  ;;  %52 = vst.msk [vmem:[#allocation2 + $0x58] sm:$0xff] %vm40_vm0, %v1010_v2  ;;  %816 = vmatpush3.msra.mxu0 %v118_v3  ;;  %v108_v15 = vld [vmem:[%s1363_s2 + $0x18] sm:$0xff]  ;;  %v107_v16 = vld [vmem:[%s1363_s2 + $0x10] sm:$0xff] }
  0x16   :  { %53 = vst.msk [vmem:[#allocation2 + $0x60] sm:$0xff] %vm40_vm0, %v1010_v2  ;;  %54 = vst.msk [vmem:[#allocation2 + $0x68] sm:$0xff] %vm40_vm0, %v1010_v2  ;;  %817 = vmatprep.subr.mxu0 %v117_v4  ;;  %v106_v17 = vld [vmem:[%s1363_s2 + $0x8] sm:$0xff]  ;;  %v105_v19 = vld [vmem:[%s1363_s2] sm:$0xff] }
  0x17   :  { %55 = vst.msk [vmem:[#allocation2 + $0x70] sm:$0xff] %vm40_vm0, %v1010_v2  ;;  %56 = vst.msk [vmem:[#allocation2 + $0x78] sm:$0xff] %vm40_vm0, %v1010_v2  ;;  %818 = vmatpush3.msra.mxu0 %v117_v4  ;;  %v755_v18 = vld [vmem:[%s1362_s1 + $0x8] sm:$0xff]   ;;  %v756_v22 = vld [vmem:[%s1362_s1 + $0x10] sm:$0xff]  }
  0x18   :  { %819 = vmatprep.subr.mxu0 %v116_v6  ;;  %v729_v21 = vunpack.c.l.bf16 %v755_v18  ;;  %v730_v23 = vunpack.c.h.bf16 %v755_v18  ;;  %v733_v24 = vunpack.c.l.bf16 %v756_v22  ;;  %v757_v25 = vld [vmem:[%s1362_s1 + $0x18] sm:$0xff]   ;;  %v734_v26 = vunpack.c.h.bf16 %v756_v22  ;;  %v758_v28 = vld [vmem:[%s1362_s1 + $0x20] sm:$0xff]   ;;  %v759_v31 = vld [vmem:[%s1362_s1 + $0x28] sm:$0xff]  }
  0x19   :  { %820 = vmatpush3.msra.mxu0 %v116_v6  ;;  %v737_v27 = vunpack.c.l.bf16 %v757_v25  ;;  %v738_v29 = vunpack.c.h.bf16 %v757_v25  ;;  %v741_v30 = vunpack.c.l.bf16 %v758_v28  ;;  %v742_v32 = vunpack.c.h.bf16 %v758_v28  ;;  %v760_v34 = vld [vmem:[%s1362_s1 + $0x30] sm:$0xff]   ;;  %v761_v37 = vld [vmem:[%s1362_s1 + $0x38] sm:$0xff]   ;;  %v90_v42 = vld [vmem:[#allocation2 + $0x8] sm:$0xff]  ;;  %s302_s1 = sld [smem:[#allocation3]] }
  0x1a   :  { %821 = vmatprep.subr.mxu0 %v115_v8  ;;  %v745_v33 = vunpack.c.l.bf16 %v759_v31  ;;  %v746_v35 = vunpack.c.h.bf16 %v759_v31  ;;  %v749_v36 = vunpack.c.l.bf16 %v760_v34  ;;  %v750_v38 = vunpack.c.h.bf16 %v760_v34  ;;  %v89_v44 = vld [vmem:[#allocation2] sm:$0xff]  ;;  %v92_v47 = vld [vmem:[#allocation2 + $0x18] sm:$0xff]  ;;  %v91_v50 = vld [vmem:[#allocation2 + $0x10] sm:$0xff] }
  0x1b   :  { %822 = vmatpush3.msra.mxu0 %v115_v8  ;;  %v753_v39 = vunpack.c.l.bf16 %v761_v37  ;;  %v754_v40 = vunpack.c.h.bf16 %v761_v37  ;;  %v94_v53 = vld [vmem:[#allocation2 + $0x28] sm:$0xff]  ;;  %v93_v56 = vld [vmem:[#allocation2 + $0x20] sm:$0xff]  ;;  %v96_v59 = vld [vmem:[#allocation2 + $0x38] sm:$0xff] }
  0x1c   :  { %823 = vmatprep.subr.mxu0 %v114_v9  ;;  %v95_v62 = vld [vmem:[#allocation2 + $0x30] sm:$0xff]  ;;  %v98_v1 = vld [vmem:[#allocation2 + $0x48] sm:$0xff]  ;;  %v97_v5 = vld [vmem:[#allocation2 + $0x40] sm:$0xff] }
  0x1d   :  { %824 = vmatpush3.msra.mxu0 %v114_v9  ;;  %v100_v8 = vld [vmem:[#allocation2 + $0x58] sm:$0xff] }
  0x1e   :  { %825 = vmatprep.subr.mxu0 %v113_v10 }
  0x1f   :  { %826 = vmatpush3.msra.mxu0 %v113_v10  ;;  %v1171_v28 = vstv %s302_s1 }
  0x20   :  { %827 = vmatprep.subr.mxu0 %v112_v11 }
  0x21   :  { %828 = vmatpush3.msra.mxu0 %v112_v11  ;;  %v99_v11 = vld [vmem:[#allocation2 + $0x50] sm:$0xff] }
  0x22   :  { %829 = vmatprep.subr.mxu0 %v111_v12 }
  0x23   :  { %830 = vmatpush3.msra.mxu0 %v111_v12 }
  0x24   :  { %831 = vmatprep.subr.mxu0 %v110_v13 }
  0x25   :  { %832 = vmatpush3.msra.mxu0 %v110_v13 }
  0x26   :  { %833 = vmatprep.subr.mxu0 %v109_v14 }
  0x27   :  { %834 = vmatpush3.msra.mxu0 %v109_v14  ;;  %v102_v14 = vld [vmem:[#allocation2 + $0x68] sm:$0xff] }
  0x28   :  { %835 = vmatprep.subr.mxu0 %v108_v15 }
  0x29   :  { %836 = vmatpush3.msra.mxu0 %v108_v15 }
  0x2a   :  { %837 = vmatprep.subr.mxu0 %v107_v16 }
  0x2b   :  { %838 = vmatpush3.msra.mxu0 %v107_v16 }
  0x2c   :  { %839 = vmatprep.subr.mxu0 %v106_v17 }
  0x2d   :  { %840 = vmatpush3.msra.mxu0 %v106_v17  ;;  %v101_v17 = vld [vmem:[#allocation2 + $0x60] sm:$0xff] }
  0x2e   :  { %841 = vmatprep.subr.mxu0 %v105_v19 }
  0x2f   :  { %842 = vmatpush3.msra.mxu0 %v105_v19 }
  0x30   :  { %844 = vmatmul.mubr.f32.vlgmr.msra.gmra.mxu0 %v726_v20  ;;  %v104_v20 = vld [vmem:[#allocation2 + $0x78] sm:$0xff] }
  0x31   :  { %846 = vmatprep.mubr.f32.mxu0 %v729_v21 }
  0x34   :  { %847 = vmatmul.mubr.f32.gmra.mxu0 %v730_v23  ;;  %v103_v23 = vld [vmem:[#allocation2 + $0x70] sm:$0xff] }
  0x35   :  { %849 = vmatprep.mubr.f32.mxu0 %v733_v24 }
  0x38   :  { %850 = vmatmul.mubr.f32.gmra.mxu0 %v734_v26 }
  0x39   :  { %852 = vmatprep.mubr.f32.mxu0 %v737_v27 }
  0x3c   :  { %853 = vmatmul.mubr.f32.gmra.mxu0 %v738_v29 }
  0x3d   :  { %855 = vmatprep.mubr.f32.mxu0 %v741_v30 }
  0x40   :  { %856 = vmatmul.mubr.f32.gmra.mxu0 %v742_v32 }
  0x41   :  { %858 = vmatprep.mubr.f32.mxu0 %v745_v33 }
  0x44   :  { %859 = vmatmul.mubr.f32.gmra.mxu0 %v746_v35 }
  0x45   :  { %861 = vmatprep.mubr.f32.mxu0 %v749_v36 }
  0x48   :  { %862 = vmatmul.mubr.f32.gmra.mxu0 %v750_v38 }
  0x49   :  { %864 = vmatprep.mubr.f32.mxu0 %v753_v39 }
  0x4c   :  { %865 = vmatmul.mubr.f32.gmra.mxu0 %v754_v40 }
  0xf0   :  { %v845_v43 = vpop.f32.mrf.mxu0 }
  0xf1   :  { %v267_v45 = vadd.f32 %v845_v43, %v90_v42 }
  0xf2   :  { %v187_v46 = vpop.f32.mrf.mxu0 }
  0xf3   :  { %284 = vst.msk [vmem:[#allocation2 + $0x8] sm:$0xff] %vm40_vm0, %v267_v45  ;;  %v266_v48 = vadd.f32 %v187_v46, %v89_v44 }
  0xf4   :  { %v848_v49 = vpop.f32.mrf.mxu0 }
  0xf5   :  { %283 = vst.msk [vmem:[#allocation2] sm:$0xff] %vm40_vm0, %v266_v48  ;;  %v269_v51 = vadd.f32 %v848_v49, %v92_v47  ;;  %v1181_v47 = vstv %s705_s23 }
  0xf6   :  { %v197_v52 = vpop.f32.mrf.mxu0 }
  0xf7   :  { %286 = vst.msk [vmem:[#allocation2 + $0x18] sm:$0xff] %vm40_vm0, %v269_v51  ;;  %v268_v54 = vadd.f32 %v197_v52, %v91_v50 }
  0xf8   :  { %v851_v55 = vpop.f32.mrf.mxu0 }
  0xf9   :  { %285 = vst.msk [vmem:[#allocation2 + $0x10] sm:$0xff] %vm40_vm0, %v268_v54  ;;  %v271_v57 = vadd.f32 %v851_v55, %v94_v53  ;;  %v1187_v54 = vstv %s706_s24 }
  0xfa   :  { %v207_v58 = vpop.f32.mrf.mxu0 }
  0xfb   :  { %288 = vst.msk [vmem:[#allocation2 + $0x28] sm:$0xff] %vm40_vm0, %v271_v57  ;;  %v270_v60 = vadd.f32 %v207_v58, %v93_v56 }
  0xfc   :  { %v854_v61 = vpop.f32.mrf.mxu0 }
  0xfd   :  { %287 = vst.msk [vmem:[#allocation2 + $0x20] sm:$0xff] %vm40_vm0, %v270_v60  ;;  %v273_v63 = vadd.f32 %v854_v61, %v96_v59 }
  0xfe   :  { %v217_v0 = vpop.f32.mrf.mxu0 }
  0xff   :  { %290 = vst.msk [vmem:[#allocation2 + $0x38] sm:$0xff] %vm40_vm0, %v273_v63  ;;  %v272_v3 = vadd.f32 %v217_v0, %v95_v62 }
 0x100   :  { %v857_v4 = vpop.f32.mrf.mxu0  ;;  %v307_v42 = vld [vmem:[#allocation2 + $0x10] sm:$0xff] }
 0x101   :  { %289 = vst.msk [vmem:[#allocation2 + $0x30] sm:$0xff] %vm40_vm0, %v272_v3  ;;  %v275_v6 = vadd.f32 %v857_v4, %v98_v1  ;;  %v324_v56 = vadd.f32 %v1171_v28, %v307_v42 }
 0x102   :  { %v227_v7 = vpop.f32.mrf.mxu0  ;;  %v310_v57 = vld [vmem:[#allocation2 + $0x28] sm:$0xff] }
 0x103   :  { %292 = vst.msk [vmem:[#allocation2 + $0x48] sm:$0xff] %vm40_vm0, %v275_v6  ;;  %v274_v9 = vadd.f32 %v227_v7, %v97_v5  ;;  %v327_v7 = vadd.f32 %v1171_v28, %v310_v57 }
 0x104   :  { %v860_v10 = vpop.f32.mrf.mxu0  ;;  %v309_v38 = vld [vmem:[#allocation2 + $0x20] sm:$0xff] }
 0x105   :  { %291 = vst.msk [vmem:[#allocation2 + $0x40] sm:$0xff] %vm40_vm0, %v274_v9  ;;  %v277_v12 = vadd.f32 %v860_v10, %v100_v8  ;;  %v326_v51 = vadd.f32 %v1171_v28, %v309_v38 }
 0x106   :  { %v237_v13 = vpop.f32.mrf.mxu0  ;;  %v312_v39 = vld [vmem:[#allocation2 + $0x38] sm:$0xff] }
 0x107   :  { %294 = vst.msk [vmem:[#allocation2 + $0x58] sm:$0xff] %vm40_vm0, %v277_v12  ;;  %v276_v15 = vadd.f32 %v237_v13, %v99_v11  ;;  %v329_v52 = vadd.f32 %v1171_v28, %v312_v39  ;;  %v342_v8 = vmax.f32 %v326_v51, 0.0  ;;  %v305_v11 = vld [vmem:[#allocation2] sm:$0xff]  ;;  %v308_v12 = vld [vmem:[#allocation2 + $0x18] sm:$0xff] }
 0x108   :  { %v863_v16 = vpop.f32.mrf.mxu0  ;;  %v311_v29 = vld [vmem:[#allocation2 + $0x30] sm:$0xff] }
 0x109   :  { %293 = vst.msk [vmem:[#allocation2 + $0x50] sm:$0xff] %vm40_vm0, %v276_v15  ;;  %v279_v18 = vadd.f32 %v863_v16, %v102_v14  ;;  %v328_v36 = vadd.f32 %v1171_v28, %v311_v29  ;;  %v345_v9 = vmax.f32 %v329_v52, 0.0  ;;  %v306_v29 = vld [vmem:[#allocation2 + $0x8] sm:$0xff] }
 0x10a   :  { %v247_v19 = vpop.f32.mrf.mxu0  ;;  %v314_v34 = vld [vmem:[#allocation2 + $0x48] sm:$0xff]  ;;  %v323_v39 = vadd.f32 %v1171_v28, %v306_v29 }
 0x10b   :  { %296 = vst.msk [vmem:[#allocation2 + $0x68] sm:$0xff] %vm40_vm0, %v279_v18  ;;  %v278_v21 = vadd.f32 %v247_v19, %v101_v17  ;;  %v331_v43 = vadd.f32 %v1171_v28, %v314_v34  ;;  %v344_v53 = vmax.f32 %v328_v36, 0.0 }
 0x10c   :  { %v866_v22 = vpop.f32.mrf.mxu0  ;;  %v313_v24 = vld [vmem:[#allocation2 + $0x40] sm:$0xff] }
 0x10d   :  { %295 = vst.msk [vmem:[#allocation2 + $0x60] sm:$0xff] %vm40_vm0, %v278_v21  ;;  %v281_v25 = vadd.f32 %v866_v22, %v104_v20  ;;  %v330_v31 = vadd.f32 %v1171_v28, %v313_v24  ;;  %v347_v61 = vmax.f32 %v331_v43, 0.0  ;;  %v361_v10 = vmul.f32 %v1181_v47, %v344_v53 }
 0x10e   :  { %v316_v26 = vld [vmem:[#allocation2 + $0x58] sm:$0xff]  ;;  %v257_v27 = vpop.f32.mrf.mxu0  ;;  %v322_v24 = vadd.f32 %v1171_v28, %v305_v11 }
 0x10f   :  { %298 = vst.msk [vmem:[#allocation2 + $0x78] sm:$0xff] %vm40_vm0, %v281_v25  ;;  %v280_v30 = vadd.f32 %v257_v27, %v103_v23  ;;  %v333_v32 = vadd.f32 %v1171_v28, %v316_v26  ;;  %v346_v44 = vmax.f32 %v330_v31, 0.0  ;;  %v364_v20 = vmul.f32 %v1181_v47, %v347_v61 }
 0x110   :  { %v315_v33 = vld [vmem:[#allocation2 + $0x50] sm:$0xff]  ;;  %v325_v25 = vadd.f32 %v1171_v28, %v308_v12  ;;  %v340_v26 = vmax.f32 %v324_v56, 0.0  ;;  %v343_v27 = vmax.f32 %v327_v7, 0.0  ;;  %v378_v34 = vadd.f32 %v1187_v54, %v361_v10 }
 0x111   :  { %v332_v35 = vadd.f32 %v1171_v28, %v315_v33  ;;  %297 = vst.msk [vmem:[#allocation2 + $0x70] sm:$0xff] %vm40_vm0, %v280_v30  ;;  %v349_v45 = vmax.f32 %v333_v32, 0.0  ;;  %v363_v1 = vmul.f32 %v1181_v47, %v346_v44  ;;  %v359_v32 = vmul.f32 %v1181_v47, %v342_v8 }
 0x112   :  { %v318_v37 = vld [vmem:[#allocation2 + $0x68] sm:$0xff]  ;;  %v381_v38 = vadd.f32 %v1187_v54, %v364_v20  ;;  %v341_v42 = vmax.f32 %v325_v25, 0.0  ;;  %v360_v44 = vmul.f32 %v1181_v47, %v343_v27 }
 0x113   :  { %v348_v40 = vmax.f32 %v332_v35, 0.0  ;;  %v335_v41 = vadd.f32 %v1171_v28, %v318_v37  ;;  %v366_v0 = vmul.f32 %v1181_v47, %v349_v45  ;;  %v380_v19 = vadd.f32 %v1187_v54, %v363_v1 }
 0x114   :  { %v317_v46 = vld [vmem:[#allocation2 + $0x60] sm:$0xff]  ;;  %v362_v35 = vmul.f32 %v1181_v47, %v345_v9  ;;  %v376_v43 = vadd.f32 %v1187_v54, %v359_v32  ;;  %v713_v45 = vmul.f32 -1.442695, %v378_v34  ;;  %v377_v52 = vadd.f32 %v1187_v54, %v360_v44 }
 0x115   :  { %v334_v48 = vadd.f32 %v1171_v28, %v317_v46  ;;  %v351_v49 = vmax.f32 %v335_v41, 0.0  ;;  %v365_v50 = vmul.f32 %v1181_v47, %v348_v40  ;;  %v383_v18 = vadd.f32 %v1187_v54, %v366_v0 }
 0x116   :  { %v320_v55 = vld [vmem:[#allocation2 + $0x78] sm:$0xff]  ;;  %v715_v33 = vmul.f32 -1.442695, %v380_v19  ;;  %v338_v40 = vmax.f32 %v322_v24, 0.0  ;;  %v357_v41 = vmul.f32 %v1181_v47, %v340_v26  ;;  %v379_v46 = vadd.f32 %v1187_v54, %v362_v35 }
 0x117   :  { %v350_v58 = vmax.f32 %v334_v48, 0.0  ;;  %v368_v59 = vmul.f32 %v1181_v47, %v351_v49  ;;  %v337_v60 = vadd.f32 %v1171_v28, %v320_v55  ;;  %v382_v63 = vadd.f32 %v1187_v54, %v365_v50 }
 0x118   :  { %v319_v62 = vld [vmem:[#allocation2 + $0x70] sm:$0xff]  ;;  %v718_v37 = vmul.f32 -1.442695, %v383_v18  ;;  %v716_v48 = vmul.f32 -1.442695, %v381_v38  ;;  %v339_v49 = vmax.f32 %v323_v39, 0.0  ;;  %v374_v50 = vadd.f32 %v1187_v54, %v357_v41 }
 0x119   :  { %v336_v3 = vadd.f32 %v1171_v28, %v319_v62  ;;  %v385_v4 = vadd.f32 %v1187_v54, %v368_v59  ;;  %v353_v5 = vmax.f32 %v337_v60, 0.0  ;;  %v367_v6 = vmul.f32 %v1181_v47, %v350_v58 }
 0x11a   :  { %v717_v17 = vmul.f32 -1.442695, %v382_v63  ;;  %v355_v28 = vmul.f32 %v1181_v47, %v338_v40  ;;  %v711_v51 = vmul.f32 -1.442695, %v376_v43  ;;  %v358_v53 = vmul.f32 %v1181_v47, %v341_v42 }
 0x11b   :  { %v352_v13 = vmax.f32 %v336_v3, 0.0  ;;  %v720_v14 = vmul.f32 -1.442695, %v385_v4  ;;  %v370_v15 = vmul.f32 %v1181_v47, %v353_v5  ;;  %v384_v16 = vadd.f32 %v1187_v54, %v367_v6 }
 0x11c   :  { %v714_v55 = vmul.f32 -1.442695, %v379_v46  ;;  %v709_v57 = vmul.f32 -1.442695, %v374_v50  ;;  %v372_v58 = vadd.f32 %v1187_v54, %v355_v28  ;;  %v356_v59 = vmul.f32 %v1181_v47, %v339_v49  ;;  %v497_v50 = vld [vmem:[%s1364_s3 + $0x68] sm:$0xff] }
 0x11d   :  { %909 = vpow2.f32 %v720_v14  ;;  %v387_v21 = vadd.f32 %v1187_v54, %v370_v15  ;;  %v719_v22 = vmul.f32 -1.442695, %v384_v16  ;;  %v369_v23 = vmul.f32 %v1181_v47, %v352_v13 }
 0x11e   :  { %v712_v61 = vmul.f32 -1.442695, %v377_v52  ;;  %v375_v62 = vadd.f32 %v1187_v54, %v358_v53  ;;  %v707_v4 = vmul.f32 -1.442695, %v372_v58  ;;  %v373_v7 = vadd.f32 %v1187_v54, %v356_v59  ;;  %v499_v52 = vld [vmem:[%s1364_s3 + $0x78] sm:$0xff]  ;;  %v496_v53 = vld [vmem:[%s1364_s3 + $0x60] sm:$0xff] }
 0x11f   :  { %v722_v30 = vmul.f32 -1.442695, %v387_v21  ;;  %911 = vpow2.f32 %v719_v22  ;;  %v386_v31 = vadd.f32 %v1187_v54, %v369_v23  ;;  %v498_v59 = vld [vmem:[%s1364_s3 + $0x70] sm:$0xff] }
 0x120   :  { %913 = vpow2.f32 %v717_v17  ;;  %v710_v6 = vmul.f32 -1.442695, %v375_v62  ;;  %v708_v12 = vmul.f32 -1.442695, %v373_v7 }
 0x121   :  { %915 = vpow2.f32 %v722_v30  ;;  %v721_v36 = vmul.f32 -1.442695, %v386_v31 }
 0x123   :  { %917 = vpow2.f32 %v721_v36 }
 0x124   :  { %919 = vpow2.f32 %v715_v33 }
 0x125   :  { %921 = vpow2.f32 %v718_v37 }
 0x126   :  { %923 = vpow2.f32 %v713_v45 }
 0x127   :  { %925 = vpow2.f32 %v716_v48 }
 0x128   :  { %927 = vpow2.f32 %v711_v51 }
 0x129   :  { %929 = vpow2.f32 %v714_v55 }
 0x12a   :  { %v910_v56 = vpop.eup %909 }
 0x12b   :  { %v449_v60 = vadd.f32 1.0, %v910_v56 }
 0x12c   :  { %v912_v63 = vpop.eup %911 }
 0x12d   :  { %v914_v0 = vpop.eup %913  ;;  %931 = vrcp.f32 %v449_v60  ;;  %v448_v1 = vadd.f32 1.0, %v912_v63  ;;  %v494_v60 = vld [vmem:[%s1364_s3 + $0x50] sm:$0xff] }
 0x12e   :  { %v916_v3 = vpop.eup %915  ;;  %933 = vpow2.f32 %v709_v57  ;;  %v446_v47 = vadd.f32 1.0, %v914_v0 }
 0x12f   :  { %v451_v5 = vadd.f32 1.0, %v916_v3  ;;  %935 = vpow2.f32 %v712_v61  ;;  %v492_v3 = vld [vmem:[%s1364_s3 + $0x40] sm:$0xff] }
 0x130   :  { %v918_v8 = vpop.eup %917  ;;  %937 = vrcp.f32 %v448_v1  ;;  %v495_v1 = vld [vmem:[%s1364_s3 + $0x58] sm:$0xff] }
 0x131   :  { %v920_v9 = vpop.eup %919  ;;  %939 = vrcp.f32 %v451_v5  ;;  %v450_v10 = vadd.f32 1.0, %v918_v8  ;;  %v493_v8 = vld [vmem:[%s1364_s3 + $0x48] sm:$0xff] }
 0x132   :  { %v922_v11 = vpop.eup %921  ;;  %941 = vpow2.f32 %v707_v4  ;;  %v444_v13 = vadd.f32 1.0, %v920_v9 }
 0x133   :  { %943 = vpow2.f32 %v710_v6  ;;  %v924_v14 = vpop.eup %923  ;;  %v447_v15 = vadd.f32 1.0, %v922_v11 }
 0x134   :  { %945 = vrcp.f32 %v446_v47  ;;  %v926_v16 = vpop.eup %925  ;;  %v442_v54 = vadd.f32 1.0, %v924_v14  ;;  %v490_v47 = vld [vmem:[%s1364_s3 + $0x30] sm:$0xff]  ;;  %v488_v14 = vld [vmem:[%s1364_s3 + $0x20] sm:$0xff] }
 0x135   :  { %947 = vrcp.f32 %v450_v10  ;;  %v928_v17 = vpop.eup %927  ;;  %v445_v19 = vadd.f32 1.0, %v926_v16 }
 0x136   :  { %949 = vpow2.f32 %v708_v12  ;;  %v930_v18 = vpop.eup %929  ;;  %v440_v23 = vadd.f32 1.0, %v928_v17 }
 0x137   :  { %951 = vrcp.f32 %v444_v13  ;;  %v443_v25 = vadd.f32 1.0, %v930_v18  ;;  %v491_v13 = vld [vmem:[%s1364_s3 + $0x38] sm:$0xff]  ;;  %v489_v18 = vld [vmem:[%s1364_s3 + $0x28] sm:$0xff] }
 0x138   :  { %953 = vrcp.f32 %v447_v15 }
 0x139   :  { %955 = vrcp.f32 %v442_v54 }
 0x13a   :  { %v932_v20 = vpop.eup %931  ;;  %957 = vrcp.f32 %v445_v19  ;;  %v486_v19 = vld [vmem:[%s1364_s3 + $0x10] sm:$0xff] }
 0x13b   :  { %v934_v21 = vpop.eup %933  ;;  %567 = vperm.xlu1 %908, %v932_v20   ;;  %959 = vrcp.f32 %v440_v23 }
 0x13c   :  { %v936_v22 = vpop.eup %935  ;;  %961 = vrcp.f32 %v443_v25  ;;  %v438_v32 = vadd.f32 1.0, %v934_v21  ;;  %v484_v25 = vld [vmem:[%s1364_s3] sm:$0xff] }
 0x13d   :  { %v938_v24 = vpop.eup %937  ;;  %v441_v30 = vadd.f32 1.0, %v936_v22 }
 0x13e   :  { %v940_v26 = vpop.eup %939 }
 0x13f   :  { %v942_v27 = vpop.eup %941  ;;  %577 = vperm.xlu0 %907, %v940_v26   ;;  %562 = vperm.xlu1 %908, %v938_v24   ;;  %963 = vrcp.f32 %v441_v30  ;;  %v487_v24 = vld [vmem:[%s1364_s3 + $0x18] sm:$0xff] }
 0x140   :  { %v944_v29 = vpop.eup %943  ;;  %965 = vrcp.f32 %v438_v32  ;;  %v436_v37 = vadd.f32 1.0, %v942_v27 }
 0x141   :  { %v946_v31 = vpop.eup %945  ;;  %v439_v35 = vadd.f32 1.0, %v944_v29 }
 0x142   :  { %v948_v33 = vpop.eup %947 }
 0x143   :  { %572 = vperm.xlu0 %907, %v948_v33   ;;  %552 = vperm.xlu1 %908, %v946_v31   ;;  %v950_v34 = vpop.eup %949  ;;  %967 = vrcp.f32 %v439_v35  ;;  %v485_v31 = vld [vmem:[%s1364_s3 + $0x8] sm:$0xff] }
 0x144   :  { %v952_v36 = vpop.eup %951  ;;  %969 = vrcp.f32 %v436_v37  ;;  %v437_v40 = vadd.f32 1.0, %v950_v34  ;;  %v613_v34 = vld [vmem:[%s1365_s4] sm:$0x3] }
 0x145   :  { %v954_v38 = vpop.eup %953 }
 0x146   :  { %v956_v39 = vpop.eup %955  ;;  %971 = vrcp.f32 %v437_v40 }
 0x147   :  { %557 = vperm.xlu0 %907, %v954_v38   ;;  %542 = vperm.xlu1 %908, %v952_v36   ;;  %v958_v41 = vpop.eup %957 }
 0x148   :  { %v960_v42 = vpop.eup %959 }
 0x149   :  { %v962_v43 = vpop.eup %961 }
 0x14b   :  { %547 = vperm.xlu0 %907, %v958_v41   ;;  %532 = vperm.xlu1 %908, %v956_v39  }
 0x14c   :  { %v964_v44 = vpop.eup %963 }
 0x14d   :  { %v966_v45 = vpop.eup %965 }
 0x14f   :  { %537 = vperm.xlu0 %907, %v962_v43   ;;  %522 = vperm.xlu1 %908, %v960_v42  }
 0x150   :  { %v968_v46 = vpop.eup %967 }
 0x151   :  { %v970_v48 = vpop.eup %969 }
 0x153   :  { %527 = vperm.xlu0 %907, %v964_v44   ;;  %512 = vperm.xlu1 %908, %v966_v45   ;;  %v972_v49 = vpop.eup %971 }
 0x157   :  { %517 = vperm.xlu0 %907, %v968_v46   ;;  %502 = vperm.xlu1 %908, %v970_v48  }
 0x15b   :  { %507 = vperm.xlu0 %907, %v972_v49  }
 0x1b6   :  { %v568_v28 = vpop.permute.xlu1 %567 }
 0x1b7   :  { %v593_v51 = vmul.f32 %v568_v28, %v497_v50 }
 0x1b9   :  { %610 = vst.msk [vmem:[%s1366_s5 + $0x68] sm:$0xff] %vm596_vm2, %v593_v51 }
 0x1ba   :  { %v578_v55 = vpop.permute.xlu0 %577  ;;  %v563_v56 = vpop.permute.xlu1 %562 }
 0x1bb   :  { %v595_v57 = vmul.f32 %v578_v55, %v499_v52  ;;  %v592_v58 = vmul.f32 %v563_v56, %v496_v53 }
 0x1bd   :  { %612 = vst.msk [vmem:[%s1366_s5 + $0x78] sm:$0xff] %vm596_vm2, %v595_v57  ;;  %609 = vst.msk [vmem:[%s1366_s5 + $0x60] sm:$0xff] %vm596_vm2, %v592_v58  ;;  %868 = vmatpush3.msra.mxu1 %v595_v57 }
 0x1be   :  { %v573_v61 = vpop.permute.xlu0 %572  ;;  %v553_v62 = vpop.permute.xlu1 %552  ;;  %869 = vmatprep.subr.mxu1 %v1010_v2 }
 0x1bf   :  { %v594_v63 = vmul.f32 %v573_v61, %v498_v59  ;;  %v590_v0 = vmul.f32 %v553_v62, %v494_v60 }
 0x1c1   :  { %611 = vst.msk [vmem:[%s1366_s5 + $0x70] sm:$0xff] %vm596_vm2, %v594_v63  ;;  %607 = vst.msk [vmem:[%s1366_s5 + $0x50] sm:$0xff] %vm596_vm2, %v590_v0  ;;  %870 = vmatpush3.msra.mxu1 %v594_v63 }
 0x1c2   :  { %871 = vmatprep.subr.mxu1 %v1010_v2  ;;  %v558_v4 = vpop.permute.xlu0 %557  ;;  %v543_v5 = vpop.permute.xlu1 %542 }
 0x1c3   :  { %v591_v6 = vmul.f32 %v558_v4, %v495_v1  ;;  %v588_v7 = vmul.f32 %v543_v5, %v492_v3  ;;  %872 = vmatpush3.msra.mxu1 %v593_v51 }
 0x1c4   :  { %873 = vmatprep.subr.mxu1 %v1010_v2 }
 0x1c5   :  { %608 = vst.msk [vmem:[%s1366_s5 + $0x58] sm:$0xff] %vm596_vm2, %v591_v6  ;;  %605 = vst.msk [vmem:[%s1366_s5 + $0x40] sm:$0xff] %vm596_vm2, %v588_v7  ;;  %874 = vmatpush3.msra.mxu1 %v592_v58 }
 0x1c6   :  { %875 = vmatprep.subr.mxu1 %v1010_v2  ;;  %v548_v9 = vpop.permute.xlu0 %547  ;;  %v533_v10 = vpop.permute.xlu1 %532 }
 0x1c7   :  { %v589_v11 = vmul.f32 %v548_v9, %v493_v8  ;;  %v586_v12 = vmul.f32 %v533_v10, %v490_v47  ;;  %876 = vmatpush3.msra.mxu1 %v591_v6 }
 0x1c8   :  { %877 = vmatprep.subr.mxu1 %v1010_v2 }
 0x1c9   :  { %606 = vst.msk [vmem:[%s1366_s5 + $0x48] sm:$0xff] %vm596_vm2, %v589_v11  ;;  %603 = vst.msk [vmem:[%s1366_s5 + $0x30] sm:$0xff] %vm596_vm2, %v586_v12  ;;  %878 = vmatpush3.msra.mxu1 %v590_v0 }
 0x1ca   :  { %879 = vmatprep.subr.mxu1 %v1010_v2  ;;  %v538_v15 = vpop.permute.xlu0 %537  ;;  %v523_v16 = vpop.permute.xlu1 %522 }
 0x1cb   :  { %v587_v17 = vmul.f32 %v538_v15, %v491_v13  ;;  %v584_v54 = vmul.f32 %v523_v16, %v488_v14  ;;  %880 = vmatpush3.msra.mxu1 %v589_v11 }
 0x1cc   :  { %881 = vmatprep.subr.mxu1 %v1010_v2 }
 0x1cd   :  { %604 = vst.msk [vmem:[%s1366_s5 + $0x38] sm:$0xff] %vm596_vm2, %v587_v17  ;;  %601 = vst.msk [vmem:[%s1366_s5 + $0x20] sm:$0xff] %vm596_vm2, %v584_v54  ;;  %882 = vmatpush3.msra.mxu1 %v588_v7 }
 0x1ce   :  { %883 = vmatprep.subr.mxu1 %v1010_v2  ;;  %v528_v20 = vpop.permute.xlu0 %527  ;;  %v513_v21 = vpop.permute.xlu1 %512 }
 0x1cf   :  { %v585_v22 = vmul.f32 %v528_v20, %v489_v18  ;;  %v582_v23 = vmul.f32 %v513_v21, %v486_v19  ;;  %884 = vmatpush3.msra.mxu1 %v587_v17 }
 0x1d0   :  { %885 = vmatprep.subr.mxu1 %v1010_v2 }
 0x1d1   :  { %602 = vst.msk [vmem:[%s1366_s5 + $0x28] sm:$0xff] %vm596_vm2, %v585_v22  ;;  %599 = vst.msk [vmem:[%s1366_s5 + $0x10] sm:$0xff] %vm596_vm2, %v582_v23  ;;  %886 = vmatpush3.msra.mxu1 %v586_v12 }
 0x1d2   :  { %887 = vmatprep.subr.mxu1 %v1010_v2  ;;  %v518_v26 = vpop.permute.xlu0 %517  ;;  %v503_v27 = vpop.permute.xlu1 %502 }
 0x1d3   :  { %v583_v29 = vmul.f32 %v518_v26, %v487_v24  ;;  %v580_v30 = vmul.f32 %v503_v27, %v484_v25  ;;  %888 = vmatpush3.msra.mxu1 %v585_v22 }
 0x1d4   :  { %889 = vmatprep.subr.mxu1 %v1010_v2 }
 0x1d5   :  { %600 = vst.msk [vmem:[%s1366_s5 + $0x18] sm:$0xff] %vm596_vm2, %v583_v29  ;;  %597 = vst.msk [vmem:[%s1366_s5] sm:$0xff] %vm596_vm2, %v580_v30  ;;  %890 = vmatpush3.msra.mxu1 %v584_v54 }
 0x1d6   :  { %891 = vmatprep.subr.mxu1 %v1010_v2  ;;  %v508_v32 = vpop.permute.xlu0 %507 }
 0x1d7   :  { %v581_v33 = vmul.f32 %v508_v32, %v485_v31  ;;  %892 = vmatpush3.msra.mxu1 %v583_v29 }
 0x1d8   :  { %893 = vmatprep.subr.mxu1 %v1010_v2 }
 0x1d9   :  { %598 = vst.msk [vmem:[%s1366_s5 + $0x8] sm:$0xff] %vm596_vm2, %v581_v33  ;;  %894 = vmatpush3.msra.mxu1 %v582_v23  ;;  %s985_s5 = scalar_lea.vmem %s695_s12, 32 }
 0x1da   :  { %895 = vmatprep.subr.mxu1 %v1010_v2  ;;  %p986_p5 = scmp.ne.s32.totalorder %s695_s12, %s985_s5  ;;  %p991_p7 = scmp.lt.s32.totalorder %s985_s5, %s985_s5 }
 0x1db   :  { %896 = vmatpush3.msra.mxu1 %v581_v33 }
 0x1dc   :  { %897 = vmatprep.subr.mxu1 %v1010_v2  ;;  %p992_p8 = por %p991_p7, %p990_p6 }
 0x1dd   :  { %898 = vmatpush3.msra.mxu1 %v580_v30 }
 0x1de   :  { %900 = vmatmul.mubr.f32.vlgmr.msra.gmra.mxu1 %v613_v34  ;;  %p993_p9 = pnand %p992_p8, %p986_p5 }
 0x29e   :  { %v680_v35 = vpop.f32.mrf.mxu1 }
 0x29f   :  { %685 = vst.msk [vmem:[#allocation6] sm:$0x3] %vm684_vm3, %v680_v35 }
 0x2a0   :  { %v901_v36 = vpop.f32.mrf.mxu1 }
 0x2a1   :  { %996 = shalt.err (!%p993_p9)
}
 0x2a2   :  { %697 = dma.vmem_to_hbm [thread:$0]  %s695_s12, 32, %s1367_s6, [#allocation4]  }
 0x2a3   :  { %1007 = dma.done.wait [#allocation4], 32  }
 0x2a4   :  { %1008 = vsyncadd [#allocation4], 4294967264 }
 0x2a5   :  { %703 = vsyncpa [#allocation4], 1 }
 0x2a6   :  { %704 = vsyncpa [#allocation5], 1 }

</bundles_post_ra>
